<compile_context>
chip_gen: v7x
topology: tpu7x:2x2x1
jax: 0.10.0
libtpu: 0.0.40
codegen_flags: <defaults>
</compile_context>

<pallas_src>
import jax
import jax.numpy as jnp
from jax.experimental import pallas as pl
from jax.experimental.pallas import tpu as pltpu

_NEG_SLOPE = 0.2   # LeakyReLU slope (module constant)
_CPAD = 8          # conv input channels padded 3 -> 8 (contraction alignment)


def _temperature_kernel(x_ref, wc_ref, bc_ref, wl_ref, sc_ref, out_ref):
    # x_ref : (TB, N, 8)  points, channels zero-padded to 8
    # wc_ref: (8, 64)     BN-folded conv weight   bc_ref: (1, 64) folded bias
    # wl_ref: (1, 64)     linear weight           sc_ref: SMEM (3,) [lin_b, scale, offset]
    tb = x_ref.shape[0]
    wc = wc_ref[...]                                                     # (8, 64)

    # Pointwise conv on the MXU, one batch element at a time; each (N,64) slab
    # is reduced to its per-channel max immediately (live set stays ~8 vregs).
    rows = []
    for b in range(tb):                                                  # static unroll
        hb = jnp.dot(x_ref[b], wc, preferred_element_type=jnp.float32)   # (N, 64) MXU
        rows.append(jnp.max(hb, axis=0, keepdims=True))                  # (1, 64)
    pooled = jnp.concatenate(rows, axis=0)                               # (TB, 64)

    # Bias + LeakyReLU hoisted past the max-pool (exact).
    pooled = pooled + bc_ref[...]
    pooled = jnp.where(pooled > 0, pooled, _NEG_SLOPE * pooled)

    # Linear(64 -> 1) as a lane-dot on the VPU.
    z = jnp.sum(pooled * wl_ref[...], axis=-1, keepdims=True)            # (TB, 1)
    z = z + sc_ref[0]

    # sigmoid(z) * (0.1 - 1/temp_factor) + 1/temp_factor
    out_ref[...] = jax.nn.sigmoid(z) * sc_ref[1] + sc_ref[2]


def _num_tensorcores():
    """Best-effort TensorCores-per-device (megacore chips have 2)."""
    try:
        kind = jax.devices()[0].device_kind.lower()
        kind = kind.replace(" ", "").replace("-", "").replace("_", "")
        for tag in ("v5e", "v5lite", "v6e", "v6lite", "trillium"):
            if tag in kind:
                return 1          # single-TC chips: best served by a 1-step grid
        return 2                  # v4 / v5p / v7x megacore (and safe default)
    except Exception:
        return 2


def temperature_net(x, params, temp_factor, *, num_cores=None, max_batch_tile=64):
    """x: (B, N, 3) float32  ->  (B, 1, 1) float32 (matches PyTorch output)."""
    B, N, cin = x.shape
    assert cin == 3
    conv_w, conv_b, gamma, beta, r_mean, r_var, lin_w, lin_b = params
    eps = 1e-5

    # Fold eval-mode BatchNorm into the conv weight/bias (host side, exact).
    bn_scale = gamma / jnp.sqrt(r_var + eps)                  # (64,)
    bn_shift = beta - r_mean * bn_scale                       # (64,)
    w_fold = (conv_w * bn_scale[:, None]).astype(jnp.float32) # (64, 3)
    b_fold = (conv_b * bn_scale + bn_shift).astype(jnp.float32)
    wc = jnp.pad(w_fold.T, ((0, _CPAD - cin), (0, 0)))        # (8, 64), zero rows exact
    bc = b_fold.reshape(1, 64)                                # (1, 64)
    wl = lin_w.reshape(1, 64).astype(jnp.float32)             # (1, 64)

    inv_tf = 1.0 / float(temp_factor)
    scalars = jnp.concatenate(
        [lin_b.astype(jnp.float32).reshape(1),
         jnp.array([0.1 - inv_tf, inv_tf], jnp.float32)])     # SMEM: [lin_b, scale, offset]

    # Grid sizing: 1 step on single-TC chips, >= num_cores parallel steps on megacore.
    n_tc = _num_tensorcores() if num_cores is None else max(1, int(num_cores))
    per_core = pl.cdiv(B, n_tc)
    tb = min(max_batch_tile, max(8, pl.cdiv(per_core, 8) * 8))
    b_pad = pl.cdiv(B, tb) * tb
    grid = (b_pad // tb,)

    # Zero-pad batch (sliced off after) and channels (zero weight rows => exact).
    x_p = jnp.pad(x.astype(jnp.float32),
                  ((0, b_pad - B), (0, 0), (0, _CPAD - cin)))           # (b_pad, N, 8)

    # VMEM budget: minor dim 8 is lane-padded to 128 in VMEM, double-buffered.
    vmem_need = 2 * tb * N * 128 * 4 + (2 << 20)
    vmem_limit = int(min(48 << 20, max(16 << 20, vmem_need)))

    cost = pl.CostEstimate(
        flops=int(2 * b_pad * N * _CPAD * 64 + 2 * b_pad * 64),
        transcendentals=int(b_pad),
        bytes_accessed=int(4 * (b_pad * N * _CPAD + b_pad + _CPAD * 64 + 64 + 64 + 3)),
    )

    out = pl.pallas_call(
        _temperature_kernel,
        out_shape=jax.ShapeDtypeStruct((b_pad, 1), jnp.float32),
        grid_spec=pltpu.PrefetchScalarGridSpec(
            num_scalar_prefetch=0,
            grid=grid,
            in_specs=[
                pl.BlockSpec((tb, N, _CPAD), lambda g: (g, 0, 0)),     # points
                pl.BlockSpec((_CPAD, 64), lambda g: (0, 0)),           # conv w (BN folded)
                pl.BlockSpec((1, 64), lambda g: (0, 0)),               # conv b (BN folded)
                pl.BlockSpec((1, 64), lambda g: (0, 0)),               # linear w
                pl.BlockSpec(memory_space=pltpu.MemorySpace.SMEM),     # scalars
            ],
            out_specs=pl.BlockSpec((tb, 1), lambda g: (g, 0)),
        ),
        compiler_params=pltpu.CompilerParams(
            dimension_semantics=("parallel",),
            vmem_limit_bytes=vmem_limit,
        ),
        cost_estimate=cost,
    )(x_p, wc, bc, wl, scalars)

    return out[:B].reshape(B, 1, 1)


def init_params(key):
    """Parameters mirroring the PyTorch module (BN stats non-trivial so the
    eval-mode fold is actually exercised)."""
    k1, k2, k3, k4, k5, k6, k7, k8 = jax.random.split(key, 8)
    bound_c = 1.0 / jnp.sqrt(3.0)
    conv_w = jax.random.uniform(k1, (64, 3), jnp.float32, -bound_c, bound_c)  # (64,3,1)->(64,3)
    conv_b = jax.random.uniform(k2, (64,), jnp.float32, -bound_c, bound_c)
    gamma = jax.random.uniform(k3, (64,), jnp.float32, 0.5, 1.5)
    beta = 0.1 * jax.random.normal(k4, (64,), jnp.float32)
    r_mean = 0.1 * jax.random.normal(k5, (64,), jnp.float32)
    r_var = jax.random.uniform(k6, (64,), jnp.float32, 0.5, 1.5)
    bound_l = 1.0 / jnp.sqrt(64.0)
    lin_w = jax.random.uniform(k7, (1, 64), jnp.float32, -bound_l, bound_l)
    lin_b = jax.random.uniform(k8, (1,), jnp.float32, -bound_l, bound_l)
    return conv_w, conv_b, gamma, beta, r_mean, r_var, lin_w, lin_b


def reference(x, params, temp_factor):
    """Pure-JAX reference of the PyTorch forward."""
    conv_w, conv_b, gamma, beta, r_mean, r_var, lin_w, lin_b = params
    eps = 1e-5
    h = jnp.einsum('bnc,oc->bno', x, conv_w) + conv_b            # (B, N, 64)
    h = (h - r_mean) / jnp.sqrt(r_var + eps) * gamma + beta      # eval-mode BN
    h = jnp.where(h > 0, h, 0.2 * h)                             # LeakyReLU
    pooled = jnp.max(h, axis=1)                                  # (B, 64)
    z = pooled @ lin_w.T + lin_b                                 # (B, 1)
    inv_tf = 1.0 / temp_factor
    return (jax.nn.sigmoid(z) * (0.1 - inv_tf) + inv_tf)[:, :, None]


if __name__ == "__main__":
    key = jax.random.PRNGKey(0)
    kx, kp = jax.random.split(key)

    B, N = 10, 128              # small shapes; B=10 exercises batch padding
    temp_factor = 100.0

    x = jax.random.normal(kx, (B, N, 3), jnp.float32)
    params = init_params(kp)
    ref = reference(x, params, temp_factor)

    # Auto-detected grid, plus both explicit grid shapes (1-step and 2-step).
    outs = [
        jax.block_until_ready(temperature_net(x, params, temp_factor)),
        jax.block_until_ready(temperature_net(x, params, temp_factor, num_cores=1)),
        jax.block_until_ready(temperature_net(x, params, temp_factor, num_cores=2)),
    ]
    for out in outs:
        assert out.shape == (B, 1, 1), out.shape
        err = float(jnp.max(jnp.abs(out - ref)))
        assert err < 5e-4, (err, out, ref)

    print("KERNEL_OK")
</pallas_src>

<mosaic_0001>
module attributes {stable_mosaic.version = 11 : i64} {
  func.func @_temperature_kernel(%arg0: i32, %arg1: memref<8x128x8xf32, #tpu.memory_space<vmem>>, %arg2: memref<8x64xf32, #tpu.memory_space<vmem>>, %arg3: memref<1x64xf32, #tpu.memory_space<vmem>>, %arg4: memref<1x64xf32, #tpu.memory_space<vmem>>, %arg5: memref<3xf32, #tpu.memory_space<smem>>, %arg6: memref<8x1xf32, #tpu.memory_space<vmem>>) attributes {dimension_semantics = [#tpu.dimension_semantics<parallel>], iteration_bounds = array<i64: 2>, scalar_prefetch = 0 : i64, scratch_operands = 0 : i64, tpu.core_type = #tpu.core_type<tc>, window_params = [{transform_indices = @transform_0, window_bounds = array<i64: 8, 128, 8>}, {pipeline_mode = #tpu.pipeline_mode<synchronous>, transform_indices = @transform_1, window_bounds = array<i64: 8, 64>}, {pipeline_mode = #tpu.pipeline_mode<synchronous>, transform_indices = @transform_2, window_bounds = array<i64: 1, 64>}, {pipeline_mode = #tpu.pipeline_mode<synchronous>, transform_indices = @transform_3, window_bounds = array<i64: 1, 64>}, {transform_indices = @transform_4, window_bounds = array<i64: 3>}, {transform_indices = @transform_5, window_bounds = array<i64: 8, 1>}]} {
    %c0 = arith.constant 0 : index
    %c0_0 = arith.constant 0 : index
    %0 = vector.load %arg2[%c0, %c0_0] : memref<8x64xf32, #tpu.memory_space<vmem>>, vector<8x64xf32>
    %c0_1 = arith.constant 0 : index
    %c0_2 = arith.constant 0 : index
    %c0_3 = arith.constant 0 : index
    %1 = vector.load %arg1[%c0_1, %c0_2, %c0_3] : memref<8x128x8xf32, #tpu.memory_space<vmem>>, vector<1x128x8xf32>
    %2 = vector.shape_cast %1 : vector<1x128x8xf32> to vector<128x8xf32>
    %cst = arith.constant dense<0.000000e+00> : vector<128x64xf32>
    %3 = tpu.matmul %2, %0, %cst {dimension_numbers = #tpu.dot_dimension_numbers<[1], [0], [0], [1], [0, 0, 1, 1], [], []>} : vector<128x8xf32>, vector<8x64xf32>, vector<128x64xf32> -> vector<128x64xf32>
    %cst_4 = arith.constant dense<0xFF800000> : vector<64xf32>
    %4 = vector.multi_reduction <maximumf>, %3, %cst_4 [0] : vector<128x64xf32> to vector<64xf32>
    %5 = vector.shape_cast %4 : vector<64xf32> to vector<1x64xf32>
    %c1 = arith.constant 1 : index
    %c0_5 = arith.constant 0 : index
    %c0_6 = arith.constant 0 : index
    %6 = vector.load %arg1[%c1, %c0_5, %c0_6] : memref<8x128x8xf32, #tpu.memory_space<vmem>>, vector<1x128x8xf32>
    %7 = vector.shape_cast %6 : vector<1x128x8xf32> to vector<128x8xf32>
    %cst_7 = arith.constant dense<0.000000e+00> : vector<128x64xf32>
    %8 = tpu.matmul %7, %0, %cst_7 {dimension_numbers = #tpu.dot_dimension_numbers<[1], [0], [0], [1], [0, 0, 1, 1], [], []>} : vector<128x8xf32>, vector<8x64xf32>, vector<128x64xf32> -> vector<128x64xf32>
    %cst_8 = arith.constant dense<0xFF800000> : vector<64xf32>
    %9 = vector.multi_reduction <maximumf>, %8, %cst_8 [0] : vector<128x64xf32> to vector<64xf32>
    %10 = vector.shape_cast %9 : vector<64xf32> to vector<1x64xf32>
    %c2 = arith.constant 2 : index
    %c0_9 = arith.constant 0 : index
    %c0_10 = arith.constant 0 : index
    %11 = vector.load %arg1[%c2, %c0_9, %c0_10] : memref<8x128x8xf32, #tpu.memory_space<vmem>>, vector<1x128x8xf32>
    %12 = vector.shape_cast %11 : vector<1x128x8xf32> to vector<128x8xf32>
    %cst_11 = arith.constant dense<0.000000e+00> : vector<128x64xf32>
    %13 = tpu.matmul %12, %0, %cst_11 {dimension_numbers = #tpu.dot_dimension_numbers<[1], [0], [0], [1], [0, 0, 1, 1], [], []>} : vector<128x8xf32>, vector<8x64xf32>, vector<128x64xf32> -> vector<128x64xf32>
    %cst_12 = arith.constant dense<0xFF800000> : vector<64xf32>
    %14 = vector.multi_reduction <maximumf>, %13, %cst_12 [0] : vector<128x64xf32> to vector<64xf32>
    %15 = vector.shape_cast %14 : vector<64xf32> to vector<1x64xf32>
    %c3 = arith.constant 3 : index
    %c0_13 = arith.constant 0 : index
    %c0_14 = arith.constant 0 : index
    %16 = vector.load %arg1[%c3, %c0_13, %c0_14] : memref<8x128x8xf32, #tpu.memory_space<vmem>>, vector<1x128x8xf32>
    %17 = vector.shape_cast %16 : vector<1x128x8xf32> to vector<128x8xf32>
    %cst_15 = arith.constant dense<0.000000e+00> : vector<128x64xf32>
    %18 = tpu.matmul %17, %0, %cst_15 {dimension_numbers = #tpu.dot_dimension_numbers<[1], [0], [0], [1], [0, 0, 1, 1], [], []>} : vector<128x8xf32>, vector<8x64xf32>, vector<128x64xf32> -> vector<128x64xf32>
    %cst_16 = arith.constant dense<0xFF800000> : vector<64xf32>
    %19 = vector.multi_reduction <maximumf>, %18, %cst_16 [0] : vector<128x64xf32> to vector<64xf32>
    %20 = vector.shape_cast %19 : vector<64xf32> to vector<1x64xf32>
    %c4 = arith.constant 4 : index
    %c0_17 = arith.constant 0 : index
    %c0_18 = arith.constant 0 : index
    %21 = vector.load %arg1[%c4, %c0_17, %c0_18] : memref<8x128x8xf32, #tpu.memory_space<vmem>>, vector<1x128x8xf32>
    %22 = vector.shape_cast %21 : vector<1x128x8xf32> to vector<128x8xf32>
    %cst_19 = arith.constant dense<0.000000e+00> : vector<128x64xf32>
    %23 = tpu.matmul %22, %0, %cst_19 {dimension_numbers = #tpu.dot_dimension_numbers<[1], [0], [0], [1], [0, 0, 1, 1], [], []>} : vector<128x8xf32>, vector<8x64xf32>, vector<128x64xf32> -> vector<128x64xf32>
    %cst_20 = arith.constant dense<0xFF800000> : vector<64xf32>
    %24 = vector.multi_reduction <maximumf>, %23, %cst_20 [0] : vector<128x64xf32> to vector<64xf32>
    %25 = vector.shape_cast %24 : vector<64xf32> to vector<1x64xf32>
    %c5 = arith.constant 5 : index
    %c0_21 = arith.constant 0 : index
    %c0_22 = arith.constant 0 : index
    %26 = vector.load %arg1[%c5, %c0_21, %c0_22] : memref<8x128x8xf32, #tpu.memory_space<vmem>>, vector<1x128x8xf32>
    %27 = vector.shape_cast %26 : vector<1x128x8xf32> to vector<128x8xf32>
    %cst_23 = arith.constant dense<0.000000e+00> : vector<128x64xf32>
    %28 = tpu.matmul %27, %0, %cst_23 {dimension_numbers = #tpu.dot_dimension_numbers<[1], [0], [0], [1], [0, 0, 1, 1], [], []>} : vector<128x8xf32>, vector<8x64xf32>, vector<128x64xf32> -> vector<128x64xf32>
    %cst_24 = arith.constant dense<0xFF800000> : vector<64xf32>
    %29 = vector.multi_reduction <maximumf>, %28, %cst_24 [0] : vector<128x64xf32> to vector<64xf32>
    %30 = vector.shape_cast %29 : vector<64xf32> to vector<1x64xf32>
    %c6 = arith.constant 6 : index
    %c0_25 = arith.constant 0 : index
    %c0_26 = arith.constant 0 : index
    %31 = vector.load %arg1[%c6, %c0_25, %c0_26] : memref<8x128x8xf32, #tpu.memory_space<vmem>>, vector<1x128x8xf32>
    %32 = vector.shape_cast %31 : vector<1x128x8xf32> to vector<128x8xf32>
    %cst_27 = arith.constant dense<0.000000e+00> : vector<128x64xf32>
    %33 = tpu.matmul %32, %0, %cst_27 {dimension_numbers = #tpu.dot_dimension_numbers<[1], [0], [0], [1], [0, 0, 1, 1], [], []>} : vector<128x8xf32>, vector<8x64xf32>, vector<128x64xf32> -> vector<128x64xf32>
    %cst_28 = arith.constant dense<0xFF800000> : vector<64xf32>
    %34 = vector.multi_reduction <maximumf>, %33, %cst_28 [0] : vector<128x64xf32> to vector<64xf32>
    %35 = vector.shape_cast %34 : vector<64xf32> to vector<1x64xf32>
    %c7 = arith.constant 7 : index
    %c0_29 = arith.constant 0 : index
    %c0_30 = arith.constant 0 : index
    %36 = vector.load %arg1[%c7, %c0_29, %c0_30] : memref<8x128x8xf32, #tpu.memory_space<vmem>>, vector<1x128x8xf32>
    %37 = vector.shape_cast %36 : vector<1x128x8xf32> to vector<128x8xf32>
    %cst_31 = arith.constant dense<0.000000e+00> : vector<128x64xf32>
    %38 = tpu.matmul %37, %0, %cst_31 {dimension_numbers = #tpu.dot_dimension_numbers<[1], [0], [0], [1], [0, 0, 1, 1], [], []>} : vector<128x8xf32>, vector<8x64xf32>, vector<128x64xf32> -> vector<128x64xf32>
    %cst_32 = arith.constant dense<0xFF800000> : vector<64xf32>
    %39 = vector.multi_reduction <maximumf>, %38, %cst_32 [0] : vector<128x64xf32> to vector<64xf32>
    %40 = vector.shape_cast %39 : vector<64xf32> to vector<1x64xf32>
    %41 = tpu.concatenate %5, %10, %15, %20, %25, %30, %35, %40 in 0 : vector<1x64xf32>, vector<1x64xf32>, vector<1x64xf32>, vector<1x64xf32>, vector<1x64xf32>, vector<1x64xf32>, vector<1x64xf32>, vector<1x64xf32> -> vector<8x64xf32>
    %c0_33 = arith.constant 0 : index
    %c0_34 = arith.constant 0 : index
    %42 = vector.load %arg3[%c0_33, %c0_34] : memref<1x64xf32, #tpu.memory_space<vmem>>, vector<1x64xf32>
    %43 = vector.broadcast %42 : vector<1x64xf32> to vector<8x64xf32>
    %44 = arith.addf %41, %43 : vector<8x64xf32>
    %cst_35 = arith.constant 0.000000e+00 : f32
    %45 = vector.broadcast %cst_35 : f32 to vector<8x64xf32>
    %46 = arith.cmpf ogt, %44, %45 : vector<8x64xf32>
    %cst_36 = arith.constant 2.000000e-01 : f32
    %47 = vector.broadcast %cst_36 : f32 to vector<8x64xf32>
    %48 = arith.mulf %47, %44 : vector<8x64xf32>
    %49 = arith.select %46, %44, %48 : vector<8x64xi1>, vector<8x64xf32>
    %c0_37 = arith.constant 0 : index
    %c0_38 = arith.constant 0 : index
    %50 = vector.load %arg4[%c0_37, %c0_38] : memref<1x64xf32, #tpu.memory_space<vmem>>, vector<1x64xf32>
    %51 = vector.broadcast %50 : vector<1x64xf32> to vector<8x64xf32>
    %52 = arith.mulf %49, %51 : vector<8x64xf32>
    %cst_39 = arith.constant dense<0.000000e+00> : vector<8xf32>
    %53 = vector.multi_reduction <add>, %52, %cst_39 [1] : vector<8x64xf32> to vector<8xf32>
    %54 = vector.shape_cast %53 : vector<8xf32> to vector<8x1xf32>
    %c0_40 = arith.constant 0 : index
    %55 = memref.load %arg5[%c0_40] : memref<3xf32, #tpu.memory_space<smem>>
    %56 = vector.broadcast %55 : f32 to vector<8x1xf32>
    %57 = arith.addf %54, %56 : vector<8x1xf32>
    %58 = arith.negf %57 : vector<8x1xf32>
    %59 = math.exp %58 : vector<8x1xf32>
    %cst_41 = arith.constant 1.000000e+00 : f32
    %60 = vector.broadcast %cst_41 : f32 to vector<8x1xf32>
    %61 = arith.addf %60, %59 : vector<8x1xf32>
    %62 = arith.divf %60, %61 : vector<8x1xf32>
    %c1_42 = arith.constant 1 : index
    %63 = memref.load %arg5[%c1_42] : memref<3xf32, #tpu.memory_space<smem>>
    %64 = vector.broadcast %63 : f32 to vector<8x1xf32>
    %65 = arith.mulf %62, %64 : vector<8x1xf32>
    %c2_43 = arith.constant 2 : index
    %66 = memref.load %arg5[%c2_43] : memref<3xf32, #tpu.memory_space<smem>>
    %67 = vector.broadcast %66 : f32 to vector<8x1xf32>
    %68 = arith.addf %65, %67 : vector<8x1xf32>
    %c0_44 = arith.constant 0 : index
    %c0_45 = arith.constant 0 : index
    %69 = vector.load %arg6[%c0_44, %c0_45] : memref<8x1xf32, #tpu.memory_space<vmem>>, vector<8x1xf32>
    tpu.vector_store %arg6[%c0_44, %c0_45], %68 {strides = array<i32>} : memref<8x1xf32, #tpu.memory_space<vmem>>, vector<8x1xf32>,
    return
  }
  func.func @transform_0(%arg0: i32) -> (i32, i32, i32) {
    %c0_i32 = arith.constant 0 : i32
    %c0_i32_0 = arith.constant 0 : i32
    %c0_i32_1 = arith.constant 0 : i32
    return %arg0, %c0_i32, %c0_i32_0 : i32, i32, i32
  }
  func.func @transform_1(%arg0: i32) -> (i32, i32) {
    %c0_i32 = arith.constant 0 : i32
    %c0_i32_0 = arith.constant 0 : i32
    %c0_i32_1 = arith.constant 0 : i32
    return %c0_i32, %c0_i32_0 : i32, i32
  }
  func.func @transform_2(%arg0: i32) -> (i32, i32) {
    %c0_i32 = arith.constant 0 : i32
    %c0_i32_0 = arith.constant 0 : i32
    %c0_i32_1 = arith.constant 0 : i32
    return %c0_i32, %c0_i32_0 : i32, i32
  }
  func.func @transform_3(%arg0: i32) -> (i32, i32) {
    %c0_i32 = arith.constant 0 : i32
    %c0_i32_0 = arith.constant 0 : i32
    %c0_i32_1 = arith.constant 0 : i32
    return %c0_i32, %c0_i32_0 : i32, i32
  }
  func.func @transform_4(%arg0: i32) -> i32 {
    %c0_i32 = arith.constant 0 : i32
    %c0_i32_0 = arith.constant 0 : i32
    return %c0_i32 : i32
  }
  func.func @transform_5(%arg0: i32) -> (i32, i32) {
    %c0_i32 = arith.constant 0 : i32
    %c0_i32_0 = arith.constant 0 : i32
    return %arg0, %c0_i32 : i32, i32
  }
}

</mosaic_0001>

<bundles_post_ra>
// kernel: tpu_custom_call.1
= control target key start
LH: loop header
LB: loop body
LE: loop exit
PB: predicated region body
PF: predicated region fallthrough
CT: control target
= control target key end

     0   :  { %10 = vsyncpa [#allocation3], 0  ;;  %s3022_s18 = smov 0   ;;  %s3486_s0 = inlined_call_operand.vmem [shape: f32[16,128,8], index: 0, kind: input, shape index: {}]   ;;  %s3487_s1 = inlined_call_operand.vmem [shape: f32[8,64], index: 1, kind: input, shape index: {}]   ;;  %s3488_s2 = inlined_call_operand.vmem [shape: f32[1,64], index: 2, kind: input, shape index: {}]   ;;  %s3489_s3 = inlined_call_operand.vmem [shape: f32[1,64], index: 3, kind: input, shape index: {}]   ;;  %s3490_s4 = inlined_call_operand.vmem [shape: f32[3], index: 4, kind: input, shape index: {}]   ;;  %s3491_s5 = inlined_call_operand.vmem [shape: f32[16,1], index: 5, kind: output, shape index: {}]  }
   0x1 LB: > { %s3028_s19 = sadd.s32 4294967295, %s2989_s18   ;;  %p2340_p0 = scmp.ge.s32.totalorder %s2989_s18, 1  ;;  %s2989_s18 = sphi %s3022_s18, %s16_s18  }
   0x2   : > { %p157_p1 = scmp.lt.s32.totalorder %s2989_s18, 3  ;;  %s179_s22 = sshll.u32 %s3490_s4, 4  ;;  %s180_s22 = int_to_ptr.vmem [resolvable:$true] %s179_s22 }
   0x3   : > { %p2949_p3 = scmp.eq.s32.totalorder %s3028_s19, 0  ;;  %s2964_s24 = scalar_lea.vmem %s180_s22, 16 }
   0x4   : > { %p3035_p2 = pnand %p2340_p0, %p157_p1  ;;  %p2965_p6 = scmp.ne.s32.totalorder %s180_s22, %s2964_s24 }
   0x5   : > { %p2972_p10 = scmp.lt.s32.totalorder %s180_s22, %s180_s22  ;;  %p2973_p11 = scmp.lt.s32.totalorder %s2964_s24, %s2964_s24 }
   0x6   : > { %p2945_p4 = pneg %p3035_p2 }
   0x7   : > { %p2974_p12 = por %p2973_p11, %p2972_p10 }
   0x8   : > { %p2946_p5 = pnand %p2949_p3, %p2945_p4 }
   0xa   : > { %p2966_p7 = pneg %p2946_p5 }
   0xc   : > { %p2967_p8 = pnand %p2966_p7, %p2965_p6 }
   0xe   : > { %p2968_p9 = pneg %p2967_p8 }
  0x10   : > { %p2975_p13 = pnand %p2974_p12, %p2968_p9 }
  0x12   : > { %2978 = shalt.err (!%p2975_p13)
}
  0x13   : > { %s2991_s25 = smov [#allocation2]   ;;  %202 = sbr.rel (%p3035_p2) target bundleno = 578 (0x242), region = 40 }
  0x14   : > { %2948 = dma.vmem_to_smem (!%p2946_p5), %s180_s22, 16, %s2991_s25, [#allocation3]  }
  0x1a   : > { %2984 = dma.done.wait (%p2949_p3), [#allocation3], 16  }
  0x1b   : > { %2986 = vsyncadd (%p2949_p3), [#allocation3], 4294967280 }
  0x1c   : > { %208 = sfence }
  0x1d   : > { %v3053_v0 = vld [vmem:[%s3487_s1] sm:$0xff]  ;;  %s2345_s28 = sshll.u32 %s3028_s19, 3  ;;  %vm259_vm0 = vcmask 64512   ;;  %vm453_vm1 = vcmask 523264   ;;  %vm2220_vm2 = vcmask 1040384   ;;  %vm2222_vm3 = vcmask 1041408  }
  0x1e   : > { %2733 = vmatprep.subr.mxu0 %v3053_v0  ;;  %2759 = vmatprep.subr.mxu1 %v3053_v0  ;;  %p232_p0 = scmp.lt.s32.totalorder %s2345_s28, 15  ;;  %vm2224_vm4 = vcmask 1042432   ;;  %vm2226_vm5 = vcmask 1043456   ;;  %vm2228_vm6 = vcmask 1044480   ;;  %vm2230_vm7 = vcmask 1045504   ;;  %s2256_s12 = sld [smem:[#allocation2]] }
  0x1f   : > { %2734 = vmatpush3.msra.mxu0 %v3053_v0  ;;  %2760 = vmatpush3.msra.mxu1 %v3053_v0  ;;  %vm2232_vm8 = vcmask 1046528   ;;  %s2592_s13 = sld [smem:[#allocation2 + $0x1]]  ;;  %p238_p1 = scmp.lt.s32.totalorder %s3028_s19, 1  ;;  %vm2271_vm10 = vcmask 7168  }
  0x20   : > { %s3494_s28 = smov (!%p232_p0, %s2345_s28), 15  ;;  %2785 = vmatprep.subr.mxu0 %v3053_v0  ;;  %2811 = vmatprep.subr.mxu1 %v3053_v0  ;;  %s2593_s14 = sld [smem:[#allocation2 + $0x2]] }
  0x21   : > { %s2596_s29 = sshll.u32 %s3494_s28, 7  ;;  %s3496_s19 = smov (!%p238_p1, %s3028_s19), 1 }
  0x22   : > { %s3065_s7 = scalar_lea.vmem %s3486_s0, %s2596_s29  ;;  %s2348_s15 = sshll.u32 %s3496_s19, 3 }
  0x23   : > { %v243_v1 = vld [vmem:[%s3065_s7] sm:$0xff]  ;;  %v244_v3 = vld [vmem:[%s3065_s7 + $0x8] sm:$0xff]  ;;  %v245_v5 = vld [vmem:[%s3065_s7 + $0x10] sm:$0xff]  ;;  %s241_s20 = scalar_lea.vmem %s3491_s5, %s2348_s15 }
  0x24   : > { %v2365_v2 = vld [vmem:[%s3065_s7 + $0x80] sm:$0xff]  ;;  %2735 = vmatprep.mubr.msk.f32.mxu0 %vm259_vm0, %v243_v1  ;;  %v2366_v4 = vld [vmem:[%s3065_s7 + $0x88] sm:$0xff]  ;;  %v2367_v6 = vld [vmem:[%s3065_s7 + $0x90] sm:$0xff] }
  0x25   : > { %2761 = vmatprep.mubr.msk.f32.mxu1 %vm259_vm0, %v2365_v2  ;;  %2736 = vmatmul.mubr.msk.f32.vlgmr.msra.gmra.mrb[0].mxu0 %vm259_vm0, %v244_v3  ;;  %v246_v7 = vld [vmem:[%s3065_s7 + $0x18] sm:$0xff]  ;;  %v247_v9 = vld [vmem:[%s3065_s7 + $0x20] sm:$0xff]  ;;  %v248_v11 = vld [vmem:[%s3065_s7 + $0x28] sm:$0xff] }
  0x26   : > { %2762 = vmatmul.mubr.msk.f32.vlgmr.msra.gmra.mrb[0].mxu1 %vm259_vm0, %v2366_v4  ;;  %2786 = vmatpush3.msra.mxu0 %v3053_v0  ;;  %v2368_v8 = vld [vmem:[%s3065_s7 + $0x98] sm:$0xff]  ;;  %v2369_v10 = vld [vmem:[%s3065_s7 + $0xa0] sm:$0xff]  ;;  %v2370_v12 = vld [vmem:[%s3065_s7 + $0xa8] sm:$0xff] }
  0x27   : > { %2812 = vmatpush3.msra.mxu1 %v3053_v0  ;;  %2738 = vmatprep.mubr.msk.f32.mxu0 %vm259_vm0, %v245_v5  ;;  %v249_v13 = vld [vmem:[%s3065_s7 + $0x30] sm:$0xff]  ;;  %v250_v15 = vld [vmem:[%s3065_s7 + $0x38] sm:$0xff]  ;;  %v251_v17 = vld [vmem:[%s3065_s7 + $0x40] sm:$0xff] }
  0x28   : > { %2764 = vmatprep.mubr.msk.f32.mxu1 %vm259_vm0, %v2367_v6  ;;  %2837 = vmatprep.subr.mxu0 %v3053_v0  ;;  %v2371_v14 = vld [vmem:[%s3065_s7 + $0xb0] sm:$0xff]  ;;  %v2372_v16 = vld [vmem:[%s3065_s7 + $0xb8] sm:$0xff]  ;;  %v2373_v18 = vld [vmem:[%s3065_s7 + $0xc0] sm:$0xff] }
  0x29   : > { %2863 = vmatprep.subr.mxu1 %v3053_v0  ;;  %2739 = vmatmul.mubr.msk.f32.gmra.mrb[2].mxu0 %vm259_vm0, %v246_v7  ;;  %v252_v19 = vld [vmem:[%s3065_s7 + $0x48] sm:$0xff]  ;;  %v253_v21 = vld [vmem:[%s3065_s7 + $0x50] sm:$0xff]  ;;  %v254_v23 = vld [vmem:[%s3065_s7 + $0x58] sm:$0xff] }
  0x2a   : > { %2765 = vmatmul.mubr.msk.f32.gmra.mrb[2].mxu1 %vm259_vm0, %v2368_v8  ;;  %2741 = vmatprep.mubr.msk.f32.mxu0 %vm259_vm0, %v247_v9  ;;  %v2374_v20 = vld [vmem:[%s3065_s7 + $0xc8] sm:$0xff]  ;;  %v2375_v22 = vld [vmem:[%s3065_s7 + $0xd0] sm:$0xff]  ;;  %v2376_v24 = vld [vmem:[%s3065_s7 + $0xd8] sm:$0xff] }
  0x2b   : > { %2767 = vmatprep.mubr.msk.f32.mxu1 %vm259_vm0, %v2369_v10  ;;  %v255_v25 = vld [vmem:[%s3065_s7 + $0x60] sm:$0xff]  ;;  %v256_v27 = vld [vmem:[%s3065_s7 + $0x68] sm:$0xff]  ;;  %v257_v29 = vld [vmem:[%s3065_s7 + $0x70] sm:$0xff] }
  0x2c   : > { %v2377_v26 = vld [vmem:[%s3065_s7 + $0xe0] sm:$0xff]  ;;  %v2378_v28 = vld [vmem:[%s3065_s7 + $0xe8] sm:$0xff]  ;;  %v2379_v30 = vld [vmem:[%s3065_s7 + $0xf0] sm:$0xff] }
  0x2d   : > { %2742 = vmatmul.mubr.msk.f32.gmra.mrb[4].mxu0 %vm259_vm0, %v248_v11  ;;  %v258_v31 = vld [vmem:[%s3065_s7 + $0x78] sm:$0xff]  ;;  %v2397_v33 = vld [vmem:[%s3065_s7 + $0x100] sm:$0xff]  ;;  %v2398_v35 = vld [vmem:[%s3065_s7 + $0x108] sm:$0xff] }
  0x2e   : > { %2768 = vmatmul.mubr.msk.f32.gmra.mrb[4].mxu1 %vm259_vm0, %v2370_v12  ;;  %2744 = vmatprep.mubr.msk.f32.mxu0 %vm259_vm0, %v249_v13  ;;  %v2380_v32 = vld [vmem:[%s3065_s7 + $0xf8] sm:$0xff]  ;;  %v2429_v34 = vld [vmem:[%s3065_s7 + $0x180] sm:$0xff]  ;;  %v2430_v36 = vld [vmem:[%s3065_s7 + $0x188] sm:$0xff] }
  0x2f   : > { %2770 = vmatprep.mubr.msk.f32.mxu1 %vm259_vm0, %v2371_v14  ;;  %v2399_v37 = vld [vmem:[%s3065_s7 + $0x110] sm:$0xff]  ;;  %v2400_v39 = vld [vmem:[%s3065_s7 + $0x118] sm:$0xff]  ;;  %v2401_v41 = vld [vmem:[%s3065_s7 + $0x120] sm:$0xff] }
  0x30   : > { %v2431_v38 = vld [vmem:[%s3065_s7 + $0x190] sm:$0xff]  ;;  %v2432_v40 = vld [vmem:[%s3065_s7 + $0x198] sm:$0xff]  ;;  %v2433_v42 = vld [vmem:[%s3065_s7 + $0x1a0] sm:$0xff] }
  0x31   : > { %2745 = vmatmul.mubr.msk.f32.gmra.mrb[6].mxu0 %vm259_vm0, %v250_v15  ;;  %v2402_v43 = vld [vmem:[%s3065_s7 + $0x128] sm:$0xff]  ;;  %v2403_v45 = vld [vmem:[%s3065_s7 + $0x130] sm:$0xff]  ;;  %v2404_v47 = vld [vmem:[%s3065_s7 + $0x138] sm:$0xff] }
  0x32   : > { %2771 = vmatmul.mubr.msk.f32.gmra.mrb[6].mxu1 %vm259_vm0, %v2372_v16  ;;  %2747 = vmatprep.mubr.msk.f32.mxu0 %vm259_vm0, %v251_v17  ;;  %v2434_v44 = vld [vmem:[%s3065_s7 + $0x1a8] sm:$0xff]  ;;  %v2435_v46 = vld [vmem:[%s3065_s7 + $0x1b0] sm:$0xff]  ;;  %v2436_v48 = vld [vmem:[%s3065_s7 + $0x1b8] sm:$0xff] }
  0x33   : > { %2773 = vmatprep.mubr.msk.f32.mxu1 %vm259_vm0, %v2373_v18  ;;  %v2405_v49 = vld [vmem:[%s3065_s7 + $0x140] sm:$0xff]  ;;  %v2406_v51 = vld [vmem:[%s3065_s7 + $0x148] sm:$0xff]  ;;  %v2407_v53 = vld [vmem:[%s3065_s7 + $0x150] sm:$0xff] }
  0x34   : > { %v2437_v50 = vld [vmem:[%s3065_s7 + $0x1c0] sm:$0xff]  ;;  %v2438_v52 = vld [vmem:[%s3065_s7 + $0x1c8] sm:$0xff]  ;;  %v2439_v54 = vld [vmem:[%s3065_s7 + $0x1d0] sm:$0xff] }
  0x35   : > { %2748 = vmatmul.mubr.msk.f32.gmra.mrb[8].mxu0 %vm259_vm0, %v252_v19  ;;  %v2408_v55 = vld [vmem:[%s3065_s7 + $0x158] sm:$0xff]  ;;  %v2409_v57 = vld [vmem:[%s3065_s7 + $0x160] sm:$0xff]  ;;  %v2410_v59 = vld [vmem:[%s3065_s7 + $0x168] sm:$0xff] }
  0x36   : > { %2774 = vmatmul.mubr.msk.f32.gmra.mrb[8].mxu1 %vm259_vm0, %v2374_v20  ;;  %2750 = vmatprep.mubr.msk.f32.mxu0 %vm259_vm0, %v253_v21  ;;  %v2440_v56 = vld [vmem:[%s3065_s7 + $0x1d8] sm:$0xff]  ;;  %v2441_v58 = vld [vmem:[%s3065_s7 + $0x1e0] sm:$0xff]  ;;  %v2442_v60 = vld [vmem:[%s3065_s7 + $0x1e8] sm:$0xff] }
  0x37   : > { %2776 = vmatprep.mubr.msk.f32.mxu1 %vm259_vm0, %v2375_v22  ;;  %v2411_v61 = vld [vmem:[%s3065_s7 + $0x170] sm:$0xff]  ;;  %v2412_v63 = vld [vmem:[%s3065_s7 + $0x178] sm:$0xff]  ;;  %v2461_v2 = vld [vmem:[%s3065_s7 + $0x200] sm:$0xff] }
  0x38   : > { %v2443_v62 = vld [vmem:[%s3065_s7 + $0x1f0] sm:$0xff]  ;;  %v2444_v1 = vld [vmem:[%s3065_s7 + $0x1f8] sm:$0xff]  ;;  %v2493_v3 = vld [vmem:[%s3065_s7 + $0x280] sm:$0xff] }
  0x39   : > { %2751 = vmatmul.mubr.msk.f32.gmra.mrb[10].mxu0 %vm259_vm0, %v254_v23  ;;  %v2462_v4 = vld [vmem:[%s3065_s7 + $0x208] sm:$0xff]  ;;  %v2463_v6 = vld [vmem:[%s3065_s7 + $0x210] sm:$0xff]  ;;  %v2464_v8 = vld [vmem:[%s3065_s7 + $0x218] sm:$0xff] }
  0x3a   : > { %2777 = vmatmul.mubr.msk.f32.gmra.mrb[10].mxu1 %vm259_vm0, %v2376_v24  ;;  %2753 = vmatprep.mubr.msk.f32.mxu0 %vm259_vm0, %v255_v25  ;;  %v2494_v5 = vld [vmem:[%s3065_s7 + $0x288] sm:$0xff]  ;;  %v2495_v7 = vld [vmem:[%s3065_s7 + $0x290] sm:$0xff]  ;;  %v2496_v9 = vld [vmem:[%s3065_s7 + $0x298] sm:$0xff] }
  0x3b   : > { %2779 = vmatprep.mubr.msk.f32.mxu1 %vm259_vm0, %v2377_v26  ;;  %v2465_v10 = vld [vmem:[%s3065_s7 + $0x220] sm:$0xff]  ;;  %v2498_v12 = vld [vmem:[%s3065_s7 + $0x2a8] sm:$0xff]  ;;  %v2467_v13 = vld [vmem:[%s3065_s7 + $0x230] sm:$0xff] }
  0x3c   : > { %v2497_v11 = vld [vmem:[%s3065_s7 + $0x2a0] sm:$0xff]  ;;  %v2499_v14 = vld [vmem:[%s3065_s7 + $0x2b0] sm:$0xff]  ;;  %v2468_v15 = vld [vmem:[%s3065_s7 + $0x238] sm:$0xff] }
  0x3d   : > { %2754 = vmatmul.mubr.msk.f32.gmra.mrb[12].mxu0 %vm259_vm0, %v256_v27  ;;  %v2500_v16 = vld [vmem:[%s3065_s7 + $0x2b8] sm:$0xff]  ;;  %v2469_v17 = vld [vmem:[%s3065_s7 + $0x240] sm:$0xff]  ;;  %v2470_v19 = vld [vmem:[%s3065_s7 + $0x248] sm:$0xff] }
  0x3e   : > { %2780 = vmatmul.mubr.msk.f32.gmra.mrb[12].mxu1 %vm259_vm0, %v2378_v28  ;;  %2756 = vmatprep.mubr.msk.f32.mxu0 %vm259_vm0, %v257_v29  ;;  %v2501_v18 = vld [vmem:[%s3065_s7 + $0x2c0] sm:$0xff]  ;;  %v2502_v20 = vld [vmem:[%s3065_s7 + $0x2c8] sm:$0xff]  ;;  %v2471_v21 = vld [vmem:[%s3065_s7 + $0x250] sm:$0xff] }
  0x3f   : > { %2782 = vmatprep.mubr.msk.f32.mxu1 %vm259_vm0, %v2379_v30  ;;  %v2503_v22 = vld [vmem:[%s3065_s7 + $0x2d0] sm:$0xff]  ;;  %v2472_v23 = vld [vmem:[%s3065_s7 + $0x258] sm:$0xff]  ;;  %v2473_v25 = vld [vmem:[%s3065_s7 + $0x260] sm:$0xff] }
  0x40   : > { %v2504_v24 = vld [vmem:[%s3065_s7 + $0x2d8] sm:$0xff]  ;;  %v2505_v26 = vld [vmem:[%s3065_s7 + $0x2e0] sm:$0xff]  ;;  %v2474_v27 = vld [vmem:[%s3065_s7 + $0x268] sm:$0xff] }
  0x41   : > { %2757 = vmatmul.mubr.msk.f32.gmra.mrb[14].mxu0 %vm259_vm0, %v258_v31  ;;  %v2506_v28 = vld [vmem:[%s3065_s7 + $0x2e8] sm:$0xff]  ;;  %v2475_v29 = vld [vmem:[%s3065_s7 + $0x270] sm:$0xff]  ;;  %v2476_v31 = vld [vmem:[%s3065_s7 + $0x278] sm:$0xff] }
  0x42   : > { %2783 = vmatmul.mubr.msk.f32.gmra.mrb[14].mxu1 %vm259_vm0, %v2380_v32  ;;  %2787 = vmatprep.mubr.msk.f32.mxu0 %vm259_vm0, %v2397_v33  ;;  %v2507_v30 = vld [vmem:[%s3065_s7 + $0x2f0] sm:$0xff]  ;;  %v2508_v32 = vld [vmem:[%s3065_s7 + $0x2f8] sm:$0xff]  ;;  %v2525_v33 = vld [vmem:[%s3065_s7 + $0x300] sm:$0xff] }
  0x43   : > { %2813 = vmatprep.mubr.msk.f32.mxu1 %vm259_vm0, %v2429_v34  ;;  %v2557_v34 = vld [vmem:[%s3065_s7 + $0x380] sm:$0xff] }
  0x45   : > { %2788 = vmatmul.mubr.msk.f32.vlgmr.msra.gmra.mrb[16].mxu0 %vm259_vm0, %v2398_v35  ;;  %v2526_v35 = vld [vmem:[%s3065_s7 + $0x308] sm:$0xff] }
  0x46   : > { %2814 = vmatmul.mubr.msk.f32.vlgmr.msra.gmra.mrb[16].mxu1 %vm259_vm0, %v2430_v36  ;;  %2838 = vmatpush3.msra.mxu0 %v3053_v0  ;;  %v2558_v36 = vld [vmem:[%s3065_s7 + $0x388] sm:$0xff] }
  0x47   : > { %2864 = vmatpush3.msra.mxu1 %v3053_v0  ;;  %2790 = vmatprep.mubr.msk.f32.mxu0 %vm259_vm0, %v2399_v37  ;;  %v2527_v37 = vld [vmem:[%s3065_s7 + $0x310] sm:$0xff] }
  0x48   : > { %2816 = vmatprep.mubr.msk.f32.mxu1 %vm259_vm0, %v2431_v38  ;;  %2889 = vmatprep.subr.mxu0 %v3053_v0  ;;  %v2559_v38 = vld [vmem:[%s3065_s7 + $0x390] sm:$0xff] }
  0x49   : > { %2915 = vmatprep.subr.mxu1 %v3053_v0  ;;  %2791 = vmatmul.mubr.msk.f32.gmra.mrb[18].mxu0 %vm259_vm0, %v2400_v39  ;;  %v2528_v39 = vld [vmem:[%s3065_s7 + $0x318] sm:$0xff] }
  0x4a   : > { %2817 = vmatmul.mubr.msk.f32.gmra.mrb[18].mxu1 %vm259_vm0, %v2432_v40  ;;  %2793 = vmatprep.mubr.msk.f32.mxu0 %vm259_vm0, %v2401_v41  ;;  %v2560_v40 = vld [vmem:[%s3065_s7 + $0x398] sm:$0xff]  ;;  %v2529_v41 = vld [vmem:[%s3065_s7 + $0x320] sm:$0xff] }
  0x4b   : > { %2819 = vmatprep.mubr.msk.f32.mxu1 %vm259_vm0, %v2433_v42  ;;  %v2561_v42 = vld [vmem:[%s3065_s7 + $0x3a0] sm:$0xff] }
  0x4d   : > { %2794 = vmatmul.mubr.msk.f32.gmra.mrb[20].mxu0 %vm259_vm0, %v2402_v43  ;;  %v2530_v43 = vld [vmem:[%s3065_s7 + $0x328] sm:$0xff] }
  0x4e   : > { %2820 = vmatmul.mubr.msk.f32.gmra.mrb[20].mxu1 %vm259_vm0, %v2434_v44  ;;  %2796 = vmatprep.mubr.msk.f32.mxu0 %vm259_vm0, %v2403_v45  ;;  %v2562_v44 = vld [vmem:[%s3065_s7 + $0x3a8] sm:$0xff]  ;;  %v2531_v45 = vld [vmem:[%s3065_s7 + $0x330] sm:$0xff] }
  0x4f   : > { %2822 = vmatprep.mubr.msk.f32.mxu1 %vm259_vm0, %v2435_v46  ;;  %v2563_v46 = vld [vmem:[%s3065_s7 + $0x3b0] sm:$0xff] }
  0x51   : > { %2797 = vmatmul.mubr.msk.f32.gmra.mrb[22].mxu0 %vm259_vm0, %v2404_v47  ;;  %v2532_v47 = vld [vmem:[%s3065_s7 + $0x338] sm:$0xff] }
  0x52   : > { %2823 = vmatmul.mubr.msk.f32.gmra.mrb[22].mxu1 %vm259_vm0, %v2436_v48  ;;  %2799 = vmatprep.mubr.msk.f32.mxu0 %vm259_vm0, %v2405_v49  ;;  %v2564_v48 = vld [vmem:[%s3065_s7 + $0x3b8] sm:$0xff]  ;;  %v2533_v49 = vld [vmem:[%s3065_s7 + $0x340] sm:$0xff] }
  0x53   : > { %2825 = vmatprep.mubr.msk.f32.mxu1 %vm259_vm0, %v2437_v50  ;;  %v2565_v50 = vld [vmem:[%s3065_s7 + $0x3c0] sm:$0xff] }
  0x55   : > { %2800 = vmatmul.mubr.msk.f32.gmra.mrb[24].mxu0 %vm259_vm0, %v2406_v51  ;;  %v2534_v51 = vld [vmem:[%s3065_s7 + $0x348] sm:$0xff] }
  0x56   : > { %2826 = vmatmul.mubr.msk.f32.gmra.mrb[24].mxu1 %vm259_vm0, %v2438_v52  ;;  %2802 = vmatprep.mubr.msk.f32.mxu0 %vm259_vm0, %v2407_v53  ;;  %v2566_v52 = vld [vmem:[%s3065_s7 + $0x3c8] sm:$0xff]  ;;  %v2535_v53 = vld [vmem:[%s3065_s7 + $0x350] sm:$0xff] }
  0x57   : > { %2828 = vmatprep.mubr.msk.f32.mxu1 %vm259_vm0, %v2439_v54  ;;  %v2567_v54 = vld [vmem:[%s3065_s7 + $0x3d0] sm:$0xff] }
  0x59   : > { %2803 = vmatmul.mubr.msk.f32.gmra.mrb[26].mxu0 %vm259_vm0, %v2408_v55  ;;  %v2536_v55 = vld [vmem:[%s3065_s7 + $0x358] sm:$0xff] }
  0x5a   : > { %2829 = vmatmul.mubr.msk.f32.gmra.mrb[26].mxu1 %vm259_vm0, %v2440_v56  ;;  %2805 = vmatprep.mubr.msk.f32.mxu0 %vm259_vm0, %v2409_v57  ;;  %v2568_v56 = vld [vmem:[%s3065_s7 + $0x3d8] sm:$0xff]  ;;  %v2537_v57 = vld [vmem:[%s3065_s7 + $0x360] sm:$0xff] }
  0x5b   : > { %2831 = vmatprep.mubr.msk.f32.mxu1 %vm259_vm0, %v2441_v58  ;;  %v2569_v58 = vld [vmem:[%s3065_s7 + $0x3e0] sm:$0xff] }
  0x5d   : > { %2806 = vmatmul.mubr.msk.f32.gmra.mrb[28].mxu0 %vm259_vm0, %v2410_v59  ;;  %v2538_v59 = vld [vmem:[%s3065_s7 + $0x368] sm:$0xff] }
  0x5e   : > { %2832 = vmatmul.mubr.msk.f32.gmra.mrb[28].mxu1 %vm259_vm0, %v2442_v60  ;;  %2808 = vmatprep.mubr.msk.f32.mxu0 %vm259_vm0, %v2411_v61  ;;  %v2570_v60 = vld [vmem:[%s3065_s7 + $0x3e8] sm:$0xff]  ;;  %v2539_v61 = vld [vmem:[%s3065_s7 + $0x370] sm:$0xff] }
  0x5f   : > { %2834 = vmatprep.mubr.msk.f32.mxu1 %vm259_vm0, %v2443_v62  ;;  %v2571_v62 = vld [vmem:[%s3065_s7 + $0x3f0] sm:$0xff] }
  0x61   : > { %2809 = vmatmul.mubr.msk.f32.gmra.mrb[30].mxu0 %vm259_vm0, %v2412_v63  ;;  %v2540_v63 = vld [vmem:[%s3065_s7 + $0x378] sm:$0xff] }
  0x62   : > { %2835 = vmatmul.mubr.msk.f32.gmra.mrb[30].mxu1 %vm259_vm0, %v2444_v1  ;;  %2839 = vmatprep.mubr.msk.f32.mxu0 %vm259_vm0, %v2461_v2  ;;  %v2572_v1 = vld [vmem:[%s3065_s7 + $0x3f8] sm:$0xff] }
  0x63   : > { %2865 = vmatprep.mubr.msk.f32.mxu1 %vm259_vm0, %v2493_v3 }
  0x65   : > { %2840 = vmatmul.mubr.msk.f32.vlgmr.msra.gmra.mrb[32].mxu0 %vm259_vm0, %v2462_v4 }
  0x66   : > { %2866 = vmatmul.mubr.msk.f32.vlgmr.msra.gmra.mrb[32].mxu1 %vm259_vm0, %v2494_v5  ;;  %2890 = vmatpush3.msra.mxu0 %v3053_v0 }
  0x67   : > { %2916 = vmatpush3.msra.mxu1 %v3053_v0  ;;  %2842 = vmatprep.mubr.msk.f32.mxu0 %vm259_vm0, %v2463_v6  ;;  %v2466_v0 = vld [vmem:[%s3065_s7 + $0x228] sm:$0xff] }
  0x68   : > { %2868 = vmatprep.mubr.msk.f32.mxu1 %vm259_vm0, %v2495_v7 }
  0x69   : > { %2843 = vmatmul.mubr.msk.f32.gmra.mrb[34].mxu0 %vm259_vm0, %v2464_v8 }
  0x6a   : > { %2869 = vmatmul.mubr.msk.f32.gmra.mrb[34].mxu1 %vm259_vm0, %v2496_v9  ;;  %2845 = vmatprep.mubr.msk.f32.mxu0 %vm259_vm0, %v2465_v10 }
  0x6b   : > { %2871 = vmatprep.mubr.msk.f32.mxu1 %vm259_vm0, %v2497_v11 }
  0x6d   : > { %2846 = vmatmul.mubr.msk.f32.gmra.mrb[36].mxu0 %vm259_vm0, %v2466_v0 }
  0x6e   : > { %2872 = vmatmul.mubr.msk.f32.gmra.mrb[36].mxu1 %vm259_vm0, %v2498_v12  ;;  %2848 = vmatprep.mubr.msk.f32.mxu0 %vm259_vm0, %v2467_v13 }
  0x6f   : > { %2874 = vmatprep.mubr.msk.f32.mxu1 %vm259_vm0, %v2499_v14 }
  0x71   : > { %2849 = vmatmul.mubr.msk.f32.gmra.mrb[38].mxu0 %vm259_vm0, %v2468_v15 }
  0x72   : > { %2875 = vmatmul.mubr.msk.f32.gmra.mrb[38].mxu1 %vm259_vm0, %v2500_v16  ;;  %2851 = vmatprep.mubr.msk.f32.mxu0 %vm259_vm0, %v2469_v17 }
  0x73   : > { %2877 = vmatprep.mubr.msk.f32.mxu1 %vm259_vm0, %v2501_v18 }
  0x75   : > { %2852 = vmatmul.mubr.msk.f32.gmra.mrb[40].mxu0 %vm259_vm0, %v2470_v19 }
  0x76   : > { %2878 = vmatmul.mubr.msk.f32.gmra.mrb[40].mxu1 %vm259_vm0, %v2502_v20  ;;  %2854 = vmatprep.mubr.msk.f32.mxu0 %vm259_vm0, %v2471_v21 }
  0x77   : > { %2880 = vmatprep.mubr.msk.f32.mxu1 %vm259_vm0, %v2503_v22 }
  0x79   : > { %2855 = vmatmul.mubr.msk.f32.gmra.mrb[42].mxu0 %vm259_vm0, %v2472_v23 }
  0x7a   : > { %2881 = vmatmul.mubr.msk.f32.gmra.mrb[42].mxu1 %vm259_vm0, %v2504_v24  ;;  %2857 = vmatprep.mubr.msk.f32.mxu0 %vm259_vm0, %v2473_v25 }
  0x7b   : > { %2883 = vmatprep.mubr.msk.f32.mxu1 %vm259_vm0, %v2505_v26 }
  0x7d   : > { %2858 = vmatmul.mubr.msk.f32.gmra.mrb[44].mxu0 %vm259_vm0, %v2474_v27 }
  0x7e   : > { %2884 = vmatmul.mubr.msk.f32.gmra.mrb[44].mxu1 %vm259_vm0, %v2506_v28  ;;  %2860 = vmatprep.mubr.msk.f32.mxu0 %vm259_vm0, %v2475_v29 }
  0x7f   : > { %2886 = vmatprep.mubr.msk.f32.mxu1 %vm259_vm0, %v2507_v30 }
  0x81   : > { %2861 = vmatmul.mubr.msk.f32.gmra.mrb[46].mxu0 %vm259_vm0, %v2476_v31 }
  0x82   : > { %2887 = vmatmul.mubr.msk.f32.gmra.mrb[46].mxu1 %vm259_vm0, %v2508_v32  ;;  %2891 = vmatprep.mubr.msk.f32.mxu0 %vm259_vm0, %v2525_v33 }
  0x83   : > { %2917 = vmatprep.mubr.msk.f32.mxu1 %vm259_vm0, %v2557_v34 }
  0x85   : > { %2892 = vmatmul.mubr.msk.f32.vlgmr.msra.gmra.mrb[48].mxu0 %vm259_vm0, %v2526_v35 }
  0x86   : > { %2918 = vmatmul.mubr.msk.f32.vlgmr.msra.gmra.mrb[48].mxu1 %vm259_vm0, %v2558_v36  ;;  %2894 = vmatprep.mubr.msk.f32.mxu0 %vm259_vm0, %v2527_v37 }
  0x87   : > { %2920 = vmatprep.mubr.msk.f32.mxu1 %vm259_vm0, %v2559_v38 }
  0x89   : > { %2895 = vmatmul.mubr.msk.f32.gmra.mrb[50].mxu0 %vm259_vm0, %v2528_v39 }
  0x8a   : > { %2921 = vmatmul.mubr.msk.f32.gmra.mrb[50].mxu1 %vm259_vm0, %v2560_v40  ;;  %2897 = vmatprep.mubr.msk.f32.mxu0 %vm259_vm0, %v2529_v41 }
  0x8b   : > { %2923 = vmatprep.mubr.msk.f32.mxu1 %vm259_vm0, %v2561_v42 }
  0x8d   : > { %2898 = vmatmul.mubr.msk.f32.gmra.mrb[52].mxu0 %vm259_vm0, %v2530_v43 }
  0x8e   : > { %2924 = vmatmul.mubr.msk.f32.gmra.mrb[52].mxu1 %vm259_vm0, %v2562_v44  ;;  %2900 = vmatprep.mubr.msk.f32.mxu0 %vm259_vm0, %v2531_v45 }
  0x8f   : > { %2926 = vmatprep.mubr.msk.f32.mxu1 %vm259_vm0, %v2563_v46 }
  0x91   : > { %2901 = vmatmul.mubr.msk.f32.gmra.mrb[54].mxu0 %vm259_vm0, %v2532_v47 }
  0x92   : > { %2927 = vmatmul.mubr.msk.f32.gmra.mrb[54].mxu1 %vm259_vm0, %v2564_v48  ;;  %2903 = vmatprep.mubr.msk.f32.mxu0 %vm259_vm0, %v2533_v49 }
  0x93   : > { %2929 = vmatprep.mubr.msk.f32.mxu1 %vm259_vm0, %v2565_v50 }
  0x95   : > { %2904 = vmatmul.mubr.msk.f32.gmra.mrb[56].mxu0 %vm259_vm0, %v2534_v51 }
  0x96   : > { %2930 = vmatmul.mubr.msk.f32.gmra.mrb[56].mxu1 %vm259_vm0, %v2566_v52  ;;  %2906 = vmatprep.mubr.msk.f32.mxu0 %vm259_vm0, %v2535_v53 }
  0x97   : > { %2932 = vmatprep.mubr.msk.f32.mxu1 %vm259_vm0, %v2567_v54 }
  0x99   : > { %2907 = vmatmul.mubr.msk.f32.gmra.mrb[58].mxu0 %vm259_vm0, %v2536_v55 }
  0x9a   : > { %2933 = vmatmul.mubr.msk.f32.gmra.mrb[58].mxu1 %vm259_vm0, %v2568_v56  ;;  %2909 = vmatprep.mubr.msk.f32.mxu0 %vm259_vm0, %v2537_v57 }
  0x9b   : > { %2935 = vmatprep.mubr.msk.f32.mxu1 %vm259_vm0, %v2569_v58 }
  0x9d   : > { %2910 = vmatmul.mubr.msk.f32.gmra.mrb[60].mxu0 %vm259_vm0, %v2538_v59 }
  0x9e   : > { %2936 = vmatmul.mubr.msk.f32.gmra.mrb[60].mxu1 %vm259_vm0, %v2570_v60  ;;  %2912 = vmatprep.mubr.msk.f32.mxu0 %vm259_vm0, %v2539_v61 }
  0x9f   : > { %2938 = vmatprep.mubr.msk.f32.mxu1 %vm259_vm0, %v2571_v62 }
  0xa1   : > { %2913 = vmatmul.mubr.msk.f32.gmra.mrb[62].mxu0 %vm259_vm0, %v2540_v63 }
  0xa2   : > { %2939 = vmatmul.mubr.msk.f32.gmra.mrb[62].mxu1 %vm259_vm0, %v2572_v1 }
  0xf8   : > { %v2737_v2 = vpop.f32.mrb[0].mxu0 }
  0xf9   : > { %v2763_v3 = vpop.f32.mrb[0].mxu1  ;;  %v374_v4 = vpop.f32.mrb[1].mxu0  ;;  %v455_v10 = vsel %vm453_vm1, %v2737_v2, -inf }
  0xfa   : > { %v622_v5 = vpop.f32.mrb[1].mxu1  ;;  %v702_v11 = vsel %vm453_vm1, %v2763_v3, -inf  ;;  %v454_v13 = vsel %vm453_vm1, %v374_v4, -inf }
  0xfb   : > { %v701_v14 = vsel %vm453_vm1, %v622_v5, -inf }
  0xfc   : > { %v2740_v6 = vpop.f32.mrb[2].mxu0 }
  0xfd   : > { %v2766_v7 = vpop.f32.mrb[2].mxu1  ;;  %v384_v8 = vpop.f32.mrb[3].mxu0  ;;  %v457_v25 = vsel %vm453_vm1, %v2740_v6, -inf }
  0xfe   : > { %v632_v9 = vpop.f32.mrb[3].mxu1  ;;  %v704_v26 = vsel %vm453_vm1, %v2766_v7, -inf  ;;  %v456_v29 = vsel %vm453_vm1, %v384_v8, -inf }
  0xff   : > { %v703_v30 = vsel %vm453_vm1, %v632_v9, -inf }
 0x100   : > { %v2743_v0 = vpop.f32.mrb[4].mxu0 }
 0x101   : > { %v2769_v12 = vpop.f32.mrb[4].mxu1  ;;  %v460_v15 = vsel %vm453_vm1, %v2743_v0, -inf  ;;  %v394_v17 = vpop.f32.mrb[5].mxu0 }
 0x102   : > { %v707_v16 = vsel %vm453_vm1, %v2769_v12, -inf  ;;  %v642_v18 = vpop.f32.mrb[5].mxu1  ;;  %v461_v19 = vmax.f32 %v455_v10, %v460_v15  ;;  %v458_v21 = vsel %vm453_vm1, %v394_v17, -inf }
 0x103   : > { %v708_v20 = vmax.f32 %v702_v11, %v707_v16  ;;  %v705_v22 = vsel %vm453_vm1, %v642_v18, -inf  ;;  %v459_v23 = vmax.f32 %v454_v13, %v458_v21 }
 0x104   : > { %v706_v24 = vmax.f32 %v701_v14, %v705_v22  ;;  %v2746_v27 = vpop.f32.mrb[6].mxu0 }
 0x105   : > { %v2772_v28 = vpop.f32.mrb[6].mxu1  ;;  %v464_v31 = vsel %vm453_vm1, %v2746_v27, -inf  ;;  %v404_v33 = vpop.f32.mrb[7].mxu0 }
 0x106   : > { %v711_v32 = vsel %vm453_vm1, %v2772_v28, -inf  ;;  %v652_v34 = vpop.f32.mrb[7].mxu1  ;;  %v465_v35 = vmax.f32 %v457_v25, %v464_v31  ;;  %v462_v37 = vsel %vm453_vm1, %v404_v33, -inf }
 0x107   : > { %v712_v36 = vmax.f32 %v704_v26, %v711_v32  ;;  %v709_v38 = vsel %vm453_vm1, %v652_v34, -inf  ;;  %v463_v39 = vmax.f32 %v456_v29, %v462_v37 }
 0x108   : > { %v710_v40 = vmax.f32 %v703_v30, %v709_v38  ;;  %v2749_v41 = vpop.f32.mrb[8].mxu0 }
 0x109   : > { %v2775_v42 = vpop.f32.mrb[8].mxu1  ;;  %v468_v43 = vsel %vm453_vm1, %v2749_v41, -inf  ;;  %v414_v45 = vpop.f32.mrb[9].mxu0 }
 0x10a   : > { %v715_v44 = vsel %vm453_vm1, %v2775_v42, -inf  ;;  %v662_v46 = vpop.f32.mrb[9].mxu1  ;;  %v469_v47 = vmax.f32 %v461_v19, %v468_v43  ;;  %v466_v49 = vsel %vm453_vm1, %v414_v45, -inf }
 0x10b   : > { %v716_v48 = vmax.f32 %v708_v20, %v715_v44  ;;  %v713_v50 = vsel %vm453_vm1, %v662_v46, -inf  ;;  %v467_v51 = vmax.f32 %v459_v23, %v466_v49 }
 0x10c   : > { %v714_v52 = vmax.f32 %v706_v24, %v713_v50  ;;  %v2752_v53 = vpop.f32.mrb[10].mxu0 }
 0x10d   : > { %v2778_v54 = vpop.f32.mrb[10].mxu1  ;;  %v472_v55 = vsel %vm453_vm1, %v2752_v53, -inf  ;;  %v424_v57 = vpop.f32.mrb[11].mxu0 }
 0x10e   : > { %v719_v56 = vsel %vm453_vm1, %v2778_v54, -inf  ;;  %v672_v58 = vpop.f32.mrb[11].mxu1  ;;  %v473_v59 = vmax.f32 %v465_v35, %v472_v55  ;;  %v470_v61 = vsel %vm453_vm1, %v424_v57, -inf }
 0x10f   : > { %v720_v60 = vmax.f32 %v712_v36, %v719_v56  ;;  %v717_v62 = vsel %vm453_vm1, %v672_v58, -inf  ;;  %v471_v63 = vmax.f32 %v463_v39, %v470_v61 }
 0x110   : > { %v718_v1 = vmax.f32 %v710_v40, %v717_v62  ;;  %v2755_v2 = vpop.f32.mrb[12].mxu0 }
 0x111   : > { %v2781_v3 = vpop.f32.mrb[12].mxu1  ;;  %v476_v4 = vsel %vm453_vm1, %v2755_v2, -inf  ;;  %v434_v6 = vpop.f32.mrb[13].mxu0 }
 0x112   : > { %v723_v5 = vsel %vm453_vm1, %v2781_v3, -inf  ;;  %v682_v7 = vpop.f32.mrb[13].mxu1  ;;  %v477_v8 = vmax.f32 %v469_v47, %v476_v4  ;;  %v474_v10 = vsel %vm453_vm1, %v434_v6, -inf }
 0x113   : > { %v724_v9 = vmax.f32 %v716_v48, %v723_v5  ;;  %v721_v11 = vsel %vm453_vm1, %v682_v7, -inf  ;;  %v475_v0 = vmax.f32 %v467_v51, %v474_v10 }
 0x114   : > { %v722_v12 = vmax.f32 %v714_v52, %v721_v11  ;;  %v2758_v13 = vpop.f32.mrb[14].mxu0 }
 0x115   : > { %v2784_v14 = vpop.f32.mrb[14].mxu1  ;;  %v482_v15 = vmax.f32 %v475_v0, %v477_v8  ;;  %v480_v17 = vsel %vm453_vm1, %v2758_v13, -inf  ;;  %v444_v19 = vpop.f32.mrb[15].mxu0 }
 0x116   : > { %v729_v16 = vmax.f32 %v722_v12, %v724_v9  ;;  %v727_v18 = vsel %vm453_vm1, %v2784_v14, -inf  ;;  %v692_v20 = vpop.f32.mrb[15].mxu1  ;;  %v481_v21 = vmax.f32 %v473_v59, %v480_v17  ;;  %v478_v23 = vsel %vm453_vm1, %v444_v19, -inf }
 0x117   : > { %v728_v22 = vmax.f32 %v720_v60, %v727_v18  ;;  %v725_v24 = vsel %vm453_vm1, %v692_v20, -inf  ;;  %v479_v25 = vmax.f32 %v471_v63, %v478_v23 }
 0x118   : > { %v726_v26 = vmax.f32 %v718_v1, %v725_v24  ;;  %v2789_v27 = vpop.f32.mrb[16].mxu0 }
 0x119   : > { %v2815_v28 = vpop.f32.mrb[16].mxu1  ;;  %v483_v29 = vmax.f32 %v479_v25, %v481_v21  ;;  %v869_v31 = vpop.f32.mrb[17].mxu0  ;;  %v949_v43 = vsel %vm453_vm1, %v2789_v27, -inf }
 0x11a   : > { %v730_v30 = vmax.f32 %v726_v26, %v728_v22  ;;  %v1116_v32 = vpop.f32.mrb[17].mxu1  ;;  %v1196_v44 = vsel %vm453_vm1, %v2815_v28, -inf  ;;  %v948_v45 = vsel %vm453_vm1, %v869_v31, -inf }
 0x11b   : > { %v484_v33 = vmax.f32 %v482_v15, %v483_v29  ;;  %v1195_v46 = vsel %vm453_vm1, %v1116_v32, -inf }
 0x11c   : > { %v731_v34 = vmax.f32 %v729_v16, %v730_v30  ;;  %v2792_v35 = vpop.f32.mrb[18].mxu0 }
 0x11d   : > { %v2818_v36 = vpop.f32.mrb[18].mxu1  ;;  %v485_v37 = vrot.slane %v484_v33, 4  ;;  %v879_v39 = vpop.f32.mrb[19].mxu0  ;;  %v951_v63 = vsel %vm453_vm1, %v2792_v35, -inf }
 0x11e   : > { %v732_v38 = vrot.slane %v731_v34, 4  ;;  %v1126_v40 = vpop.f32.mrb[19].mxu1  ;;  %v1198_v1 = vsel %vm453_vm1, %v2818_v36, -inf  ;;  %v950_v2 = vsel %vm453_vm1, %v879_v39, -inf }
 0x11f   : > { %v486_v41 = vmax.f32 %v484_v33, %v485_v37  ;;  %v1197_v3 = vsel %vm453_vm1, %v1126_v40, -inf }
 0x120   : > { %v733_v42 = vmax.f32 %v731_v34, %v732_v38  ;;  %v2795_v47 = vpop.f32.mrb[20].mxu0 }
 0x121   : > { %v2821_v48 = vpop.f32.mrb[20].mxu1  ;;  %v487_v49 = vrot.slane %v486_v41, 2  ;;  %v954_v51 = vsel %vm453_vm1, %v2795_v47, -inf  ;;  %v889_v53 = vpop.f32.mrb[21].mxu0 }
 0x122   : > { %v734_v50 = vrot.slane %v733_v42, 2  ;;  %v1201_v52 = vsel %vm453_vm1, %v2821_v48, -inf  ;;  %v1136_v54 = vpop.f32.mrb[21].mxu1  ;;  %v955_v55 = vmax.f32 %v949_v43, %v954_v51  ;;  %v952_v57 = vsel %vm453_vm1, %v889_v53, -inf }
 0x123   : > { %v1202_v56 = vmax.f32 %v1196_v44, %v1201_v52  ;;  %v1199_v58 = vsel %vm453_vm1, %v1136_v54, -inf  ;;  %v488_v59 = vmax.f32 %v486_v41, %v487_v49  ;;  %v953_v61 = vmax.f32 %v948_v45, %v952_v57 }
 0x124   : > { %v735_v60 = vmax.f32 %v733_v42, %v734_v50  ;;  %v1200_v62 = vmax.f32 %v1195_v46, %v1199_v58  ;;  %v2798_v4 = vpop.f32.mrb[22].mxu0 }
 0x125   : > { %v2824_v5 = vpop.f32.mrb[22].mxu1  ;;  %v489_v6 = vrot.slane %v488_v59, 1  ;;  %v958_v8 = vsel %vm453_vm1, %v2798_v4, -inf  ;;  %v899_v10 = vpop.f32.mrb[23].mxu0 }
 0x126   : > { %v736_v7 = vrot.slane %v735_v60, 1  ;;  %v1205_v9 = vsel %vm453_vm1, %v2824_v5, -inf  ;;  %v1146_v11 = vpop.f32.mrb[23].mxu1  ;;  %v959_v0 = vmax.f32 %v951_v63, %v958_v8  ;;  %v956_v13 = vsel %vm453_vm1, %v899_v10, -inf }
 0x127   : > { %v1206_v12 = vmax.f32 %v1198_v1, %v1205_v9  ;;  %v1203_v14 = vsel %vm453_vm1, %v1146_v11, -inf  ;;  %v490_v15 = vmax.f32 %v488_v59, %v489_v6  ;;  %v957_v17 = vmax.f32 %v950_v2, %v956_v13 }
 0x128   : > { %v737_v16 = vmax.f32 %v735_v60, %v736_v7  ;;  %v1204_v18 = vmax.f32 %v1197_v3, %v1203_v14  ;;  %v2801_v19 = vpop.f32.mrb[24].mxu0 }
 0x129   : > { %v2827_v20 = vpop.f32.mrb[24].mxu1  ;;  %v962_v22 = vsel %vm453_vm1, %v2801_v19, -inf  ;;  %v909_v24 = vpop.f32.mrb[25].mxu0 }
 0x12a   : > { %v3382_v21 = vsel %vm2220_vm2, %v490_v15, %v737_v16  ;;  %v1209_v23 = vsel %vm453_vm1, %v2827_v20, -inf  ;;  %v1156_v25 = vpop.f32.mrb[25].mxu1  ;;  %v963_v26 = vmax.f32 %v955_v55, %v962_v22  ;;  %v960_v28 = vsel %vm453_vm1, %v909_v24, -inf }
 0x12b   : > { %v1210_v27 = vmax.f32 %v1202_v56, %v1209_v23  ;;  %v1207_v29 = vsel %vm453_vm1, %v1156_v25, -inf  ;;  %v961_v30 = vmax.f32 %v953_v61, %v960_v28 }
 0x12c   : > { %v1208_v31 = vmax.f32 %v1200_v62, %v1207_v29  ;;  %v2804_v32 = vpop.f32.mrb[26].mxu0 }
 0x12d   : > { %v2830_v33 = vpop.f32.mrb[26].mxu1  ;;  %v966_v34 = vsel %vm453_vm1, %v2804_v32, -inf  ;;  %v919_v36 = vpop.f32.mrb[27].mxu0 }
 0x12e   : > { %v1213_v35 = vsel %vm453_vm1, %v2830_v33, -inf  ;;  %v1166_v37 = vpop.f32.mrb[27].mxu1  ;;  %v967_v38 = vmax.f32 %v959_v0, %v966_v34  ;;  %v964_v40 = vsel %vm453_vm1, %v919_v36, -inf }
 0x12f   : > { %v1214_v39 = vmax.f32 %v1206_v12, %v1213_v35  ;;  %v1211_v41 = vsel %vm453_vm1, %v1166_v37, -inf  ;;  %v965_v42 = vmax.f32 %v957_v17, %v964_v40 }
 0x130   : > { %v1212_v43 = vmax.f32 %v1204_v18, %v1211_v41  ;;  %v2807_v44 = vpop.f32.mrb[28].mxu0 }
 0x131   : > { %v2833_v45 = vpop.f32.mrb[28].mxu1  ;;  %v970_v46 = vsel %vm453_vm1, %v2807_v44, -inf  ;;  %v929_v48 = vpop.f32.mrb[29].mxu0 }
 0x132   : > { %v1217_v47 = vsel %vm453_vm1, %v2833_v45, -inf  ;;  %v1176_v49 = vpop.f32.mrb[29].mxu1  ;;  %v971_v50 = vmax.f32 %v963_v26, %v970_v46  ;;  %v968_v52 = vsel %vm453_vm1, %v929_v48, -inf }
 0x133   : > { %v1218_v51 = vmax.f32 %v1210_v27, %v1217_v47  ;;  %v1215_v53 = vsel %vm453_vm1, %v1176_v49, -inf  ;;  %v969_v54 = vmax.f32 %v961_v30, %v968_v52 }
 0x134   : > { %v1216_v55 = vmax.f32 %v1208_v31, %v1215_v53  ;;  %v2810_v56 = vpop.f32.mrb[30].mxu0 }
 0x135   : > { %v2836_v57 = vpop.f32.mrb[30].mxu1  ;;  %v976_v58 = vmax.f32 %v969_v54, %v971_v50  ;;  %v974_v60 = vsel %vm453_vm1, %v2810_v56, -inf  ;;  %v939_v62 = vpop.f32.mrb[31].mxu0 }
 0x136   : > { %v1223_v59 = vmax.f32 %v1216_v55, %v1218_v51  ;;  %v1221_v61 = vsel %vm453_vm1, %v2836_v57, -inf  ;;  %v1186_v63 = vpop.f32.mrb[31].mxu1  ;;  %v975_v1 = vmax.f32 %v967_v38, %v974_v60  ;;  %v972_v3 = vsel %vm453_vm1, %v939_v62, -inf }
 0x137   : > { %v1222_v2 = vmax.f32 %v1214_v39, %v1221_v61  ;;  %v1219_v4 = vsel %vm453_vm1, %v1186_v63, -inf  ;;  %v973_v5 = vmax.f32 %v965_v42, %v972_v3 }
 0x138   : > { %v1220_v6 = vmax.f32 %v1212_v43, %v1219_v4  ;;  %v2841_v7 = vpop.f32.mrb[32].mxu0 }
 0x139   : > { %v2867_v8 = vpop.f32.mrb[32].mxu1  ;;  %v977_v9 = vmax.f32 %v973_v5, %v975_v1  ;;  %v1363_v11 = vpop.f32.mrb[33].mxu0  ;;  %v1443_v23 = vsel %vm453_vm1, %v2841_v7, -inf }
 0x13a   : > { %v1224_v10 = vmax.f32 %v1220_v6, %v1222_v2  ;;  %v1610_v0 = vpop.f32.mrb[33].mxu1  ;;  %v1690_v24 = vsel %vm453_vm1, %v2867_v8, -inf  ;;  %v1442_v25 = vsel %vm453_vm1, %v1363_v11, -inf }
 0x13b   : > { %v978_v12 = vmax.f32 %v976_v58, %v977_v9  ;;  %v1689_v26 = vsel %vm453_vm1, %v1610_v0, -inf }
 0x13c   : > { %v1225_v13 = vmax.f32 %v1223_v59, %v1224_v10  ;;  %v2844_v14 = vpop.f32.mrb[34].mxu0 }
 0x13d   : > { %v2870_v15 = vpop.f32.mrb[34].mxu1  ;;  %v979_v16 = vrot.slane %v978_v12, 4  ;;  %v1373_v18 = vpop.f32.mrb[35].mxu0  ;;  %v1445_v43 = vsel %vm453_vm1, %v2844_v14, -inf }
 0x13e   : > { %v1226_v17 = vrot.slane %v1225_v13, 4  ;;  %v1620_v19 = vpop.f32.mrb[35].mxu1  ;;  %v1692_v44 = vsel %vm453_vm1, %v2870_v15, -inf  ;;  %v1444_v45 = vsel %vm453_vm1, %v1373_v18, -inf }
 0x13f   : > { %v980_v20 = vmax.f32 %v978_v12, %v979_v16  ;;  %v1691_v46 = vsel %vm453_vm1, %v1620_v19, -inf }
 0x140   : > { %v1227_v22 = vmax.f32 %v1225_v13, %v1226_v17  ;;  %v2847_v27 = vpop.f32.mrb[36].mxu0 }
 0x141   : > { %v2873_v28 = vpop.f32.mrb[36].mxu1  ;;  %v981_v29 = vrot.slane %v980_v20, 2  ;;  %v1448_v31 = vsel %vm453_vm1, %v2847_v27, -inf  ;;  %v1383_v33 = vpop.f32.mrb[37].mxu0 }
 0x142   : > { %v1228_v30 = vrot.slane %v1227_v22, 2  ;;  %v1695_v32 = vsel %vm453_vm1, %v2873_v28, -inf  ;;  %v1630_v34 = vpop.f32.mrb[37].mxu1  ;;  %v1449_v35 = vmax.f32 %v1443_v23, %v1448_v31  ;;  %v1446_v37 = vsel %vm453_vm1, %v1383_v33, -inf }
 0x143   : > { %v1696_v36 = vmax.f32 %v1690_v24, %v1695_v32  ;;  %v1693_v38 = vsel %vm453_vm1, %v1630_v34, -inf  ;;  %v982_v39 = vmax.f32 %v980_v20, %v981_v29  ;;  %v1447_v41 = vmax.f32 %v1442_v25, %v1446_v37 }
 0x144   : > { %v1229_v40 = vmax.f32 %v1227_v22, %v1228_v30  ;;  %v1694_v42 = vmax.f32 %v1689_v26, %v1693_v38  ;;  %v2850_v47 = vpop.f32.mrb[38].mxu0 }
 0x145   : > { %v2876_v48 = vpop.f32.mrb[38].mxu1  ;;  %v983_v49 = vrot.slane %v982_v39, 1  ;;  %v1452_v51 = vsel %vm453_vm1, %v2850_v47, -inf  ;;  %v1393_v53 = vpop.f32.mrb[39].mxu0 }
 0x146   : > { %v1230_v50 = vrot.slane %v1229_v40, 1  ;;  %v1699_v52 = vsel %vm453_vm1, %v2876_v48, -inf  ;;  %v1640_v54 = vpop.f32.mrb[39].mxu1  ;;  %v1453_v55 = vmax.f32 %v1445_v43, %v1452_v51  ;;  %v1450_v57 = vsel %vm453_vm1, %v1393_v53, -inf }
 0x147   : > { %v1700_v56 = vmax.f32 %v1692_v44, %v1699_v52  ;;  %v1697_v58 = vsel %vm453_vm1, %v1640_v54, -inf  ;;  %v984_v59 = vmax.f32 %v982_v39, %v983_v49  ;;  %v1451_v61 = vmax.f32 %v1444_v45, %v1450_v57 }
 0x148   : > { %v1231_v60 = vmax.f32 %v1229_v40, %v1230_v50  ;;  %v1698_v62 = vmax.f32 %v1691_v46, %v1697_v58  ;;  %v2853_v63 = vpop.f32.mrb[40].mxu0 }
 0x149   : > { %v2879_v1 = vpop.f32.mrb[40].mxu1  ;;  %v2223_v2 = vsel %vm2222_vm3, %v3382_v21, %v984_v59  ;;  %v1456_v3 = vsel %vm453_vm1, %v2853_v63, -inf  ;;  %v1403_v5 = vpop.f32.mrb[41].mxu0 }
 0x14a   : > { %v1703_v4 = vsel %vm453_vm1, %v2879_v1, -inf  ;;  %v1650_v6 = vpop.f32.mrb[41].mxu1  ;;  %v3421_v7 = vsel %vm2224_vm4, %v2223_v2, %v1231_v60  ;;  %v1457_v8 = vmax.f32 %v1449_v35, %v1456_v3  ;;  %v1454_v10 = vsel %vm453_vm1, %v1403_v5, -inf }
 0x14b   : > { %v1704_v9 = vmax.f32 %v1696_v36, %v1703_v4  ;;  %v1455_v11 = vmax.f32 %v1447_v41, %v1454_v10  ;;  %v1701_v0 = vsel %vm453_vm1, %v1650_v6, -inf }
 0x14c   : > { %v1702_v12 = vmax.f32 %v1694_v42, %v1701_v0  ;;  %v2856_v13 = vpop.f32.mrb[42].mxu0 }
 0x14d   : > { %v2882_v14 = vpop.f32.mrb[42].mxu1  ;;  %v1460_v21 = vsel %vm453_vm1, %v2856_v13, -inf  ;;  %v1413_v16 = vpop.f32.mrb[43].mxu0 }
 0x14e   : > { %v1707_v15 = vsel %vm453_vm1, %v2882_v14, -inf  ;;  %v1660_v17 = vpop.f32.mrb[43].mxu1  ;;  %v1461_v18 = vmax.f32 %v1453_v55, %v1460_v21  ;;  %v1458_v20 = vsel %vm453_vm1, %v1413_v16, -inf }
 0x14f   : > { %v1708_v19 = vmax.f32 %v1700_v56, %v1707_v15  ;;  %v1705_v22 = vsel %vm453_vm1, %v1660_v17, -inf  ;;  %v1459_v23 = vmax.f32 %v1451_v61, %v1458_v20 }
 0x150   : > { %v1706_v24 = vmax.f32 %v1698_v62, %v1705_v22  ;;  %v2859_v25 = vpop.f32.mrb[44].mxu0 }
 0x151   : > { %v2885_v26 = vpop.f32.mrb[44].mxu1  ;;  %v1464_v27 = vsel %vm453_vm1, %v2859_v25, -inf  ;;  %v1423_v29 = vpop.f32.mrb[45].mxu0 }
 0x152   : > { %v1711_v28 = vsel %vm453_vm1, %v2885_v26, -inf  ;;  %v1670_v30 = vpop.f32.mrb[45].mxu1  ;;  %v1465_v31 = vmax.f32 %v1457_v8, %v1464_v27  ;;  %v1462_v33 = vsel %vm453_vm1, %v1423_v29, -inf }
 0x153   : > { %v1712_v32 = vmax.f32 %v1704_v9, %v1711_v28  ;;  %v1709_v34 = vsel %vm453_vm1, %v1670_v30, -inf  ;;  %v1463_v35 = vmax.f32 %v1455_v11, %v1462_v33 }
 0x154   : > { %v1710_v36 = vmax.f32 %v1702_v12, %v1709_v34  ;;  %v2862_v37 = vpop.f32.mrb[46].mxu0 }
 0x155   : > { %v2888_v38 = vpop.f32.mrb[46].mxu1  ;;  %v1470_v39 = vmax.f32 %v1463_v35, %v1465_v31  ;;  %v1468_v41 = vsel %vm453_vm1, %v2862_v37, -inf  ;;  %v1433_v43 = vpop.f32.mrb[47].mxu0 }
 0x156   : > { %v1717_v40 = vmax.f32 %v1710_v36, %v1712_v32  ;;  %v1715_v42 = vsel %vm453_vm1, %v2888_v38, -inf  ;;  %v1680_v44 = vpop.f32.mrb[47].mxu1  ;;  %v1469_v45 = vmax.f32 %v1461_v18, %v1468_v41  ;;  %v1466_v47 = vsel %vm453_vm1, %v1433_v43, -inf }
 0x157   : > { %v1716_v46 = vmax.f32 %v1708_v19, %v1715_v42  ;;  %v1713_v48 = vsel %vm453_vm1, %v1680_v44, -inf  ;;  %v1467_v49 = vmax.f32 %v1459_v23, %v1466_v47 }
 0x158   : > { %v1714_v50 = vmax.f32 %v1706_v24, %v1713_v48  ;;  %v2893_v51 = vpop.f32.mrb[48].mxu0 }
 0x159   : > { %v2919_v52 = vpop.f32.mrb[48].mxu1  ;;  %v1471_v53 = vmax.f32 %v1467_v49, %v1469_v45  ;;  %v1857_v55 = vpop.f32.mrb[49].mxu0  ;;  %v1937_v4 = vsel %vm453_vm1, %v2893_v51, -inf }
 0x15a   : > { %v1718_v54 = vmax.f32 %v1714_v50, %v1716_v46  ;;  %v2104_v56 = vpop.f32.mrb[49].mxu1  ;;  %v2184_v5 = vsel %vm453_vm1, %v2919_v52, -inf  ;;  %v1936_v6 = vsel %vm453_vm1, %v1857_v55, -inf }
 0x15b   : > { %v1472_v57 = vmax.f32 %v1470_v39, %v1471_v53  ;;  %v2183_v8 = vsel %vm453_vm1, %v2104_v56, -inf }
 0x15c   : > { %v1719_v58 = vmax.f32 %v1717_v40, %v1718_v54  ;;  %v2896_v59 = vpop.f32.mrb[50].mxu0 }
 0x15d   : > { %v2922_v60 = vpop.f32.mrb[50].mxu1  ;;  %v1473_v61 = vrot.slane %v1472_v57, 4  ;;  %v1867_v63 = vpop.f32.mrb[51].mxu0  ;;  %v1939_v24 = vsel %vm453_vm1, %v2896_v59, -inf }
 0x15e   : > { %v1720_v62 = vrot.slane %v1719_v58, 4  ;;  %v2114_v1 = vpop.f32.mrb[51].mxu1  ;;  %v2186_v25 = vsel %vm453_vm1, %v2922_v60, -inf  ;;  %v1938_v26 = vsel %vm453_vm1, %v1867_v63, -inf }
 0x15f   : > { %v1474_v2 = vmax.f32 %v1472_v57, %v1473_v61  ;;  %v2185_v27 = vsel %vm453_vm1, %v2114_v1, -inf }
 0x160   : > { %v1721_v3 = vmax.f32 %v1719_v58, %v1720_v62  ;;  %v2899_v9 = vpop.f32.mrb[52].mxu0 }
 0x161   : > { %v2925_v10 = vpop.f32.mrb[52].mxu1  ;;  %v1475_v11 = vrot.slane %v1474_v2, 2  ;;  %v1942_v12 = vsel %vm453_vm1, %v2899_v9, -inf  ;;  %v1877_v14 = vpop.f32.mrb[53].mxu0 }
 0x162   : > { %v1722_v0 = vrot.slane %v1721_v3, 2  ;;  %v2189_v13 = vsel %vm453_vm1, %v2925_v10, -inf  ;;  %v2124_v21 = vpop.f32.mrb[53].mxu1  ;;  %v1943_v15 = vmax.f32 %v1937_v4, %v1942_v12  ;;  %v1940_v17 = vsel %vm453_vm1, %v1877_v14, -inf }
 0x163   : > { %v2190_v16 = vmax.f32 %v2184_v5, %v2189_v13  ;;  %v2187_v18 = vsel %vm453_vm1, %v2124_v21, -inf  ;;  %v1476_v19 = vmax.f32 %v1474_v2, %v1475_v11  ;;  %v1941_v22 = vmax.f32 %v1936_v6, %v1940_v17 }
 0x164   : > { %v1723_v20 = vmax.f32 %v1721_v3, %v1722_v0  ;;  %v2188_v23 = vmax.f32 %v2183_v8, %v2187_v18  ;;  %v2902_v28 = vpop.f32.mrb[54].mxu0 }
 0x165   : > { %v2928_v29 = vpop.f32.mrb[54].mxu1  ;;  %v1477_v30 = vrot.slane %v1476_v19, 1  ;;  %v1946_v32 = vsel %vm453_vm1, %v2902_v28, -inf  ;;  %v1887_v34 = vpop.f32.mrb[55].mxu0 }
 0x166   : > { %v1724_v31 = vrot.slane %v1723_v20, 1  ;;  %v2193_v33 = vsel %vm453_vm1, %v2928_v29, -inf  ;;  %v2134_v35 = vpop.f32.mrb[55].mxu1  ;;  %v1947_v36 = vmax.f32 %v1939_v24, %v1946_v32  ;;  %v1944_v38 = vsel %vm453_vm1, %v1887_v34, -inf }
 0x167   : > { %v2194_v37 = vmax.f32 %v2186_v25, %v2193_v33  ;;  %v2191_v39 = vsel %vm453_vm1, %v2134_v35, -inf  ;;  %v1478_v40 = vmax.f32 %v1476_v19, %v1477_v30  ;;  %v1945_v42 = vmax.f32 %v1938_v26, %v1944_v38 }
 0x168   : > { %v1725_v41 = vmax.f32 %v1723_v20, %v1724_v31  ;;  %v2192_v43 = vmax.f32 %v2185_v27, %v2191_v39  ;;  %v2905_v44 = vpop.f32.mrb[56].mxu0 }
 0x169   : > { %v2931_v45 = vpop.f32.mrb[56].mxu1  ;;  %v1950_v46 = vsel %vm453_vm1, %v2905_v44, -inf  ;;  %v1897_v48 = vpop.f32.mrb[57].mxu0  ;;  %v2227_v50 = vsel %vm2226_vm5, %v3421_v7, %v1478_v40 }
 0x16a   : > { %v2197_v47 = vsel %vm453_vm1, %v2931_v45, -inf  ;;  %v2144_v49 = vpop.f32.mrb[57].mxu1  ;;  %v1951_v51 = vmax.f32 %v1943_v15, %v1950_v46  ;;  %v1948_v53 = vsel %vm453_vm1, %v1897_v48, -inf  ;;  %v2229_v57 = vsel %vm2228_vm6, %v2227_v50, %v1725_v41  ;;  %v2589_v48 = vld [vmem:[%s3488_s2] ss:$0 sm:$0xff] }
 0x16b   : > { %v2198_v52 = vmax.f32 %v2190_v16, %v2197_v47  ;;  %v2195_v54 = vsel %vm453_vm1, %v2144_v49, -inf  ;;  %v1949_v55 = vmax.f32 %v1941_v22, %v1948_v53  ;;  %v2590_v53 = vld [vmem:[%s3489_s3] ss:$0 sm:$0xff] }
 0x16c   : > { %v2196_v56 = vmax.f32 %v2188_v23, %v2195_v54  ;;  %v2908_v58 = vpop.f32.mrb[58].mxu0 }
 0x16d   : > { %v2934_v59 = vpop.f32.mrb[58].mxu1  ;;  %v1954_v60 = vsel %vm453_vm1, %v2908_v58, -inf  ;;  %v1907_v62 = vpop.f32.mrb[59].mxu0  ;;  %v2257_v58 = vstv %s2256_s12 }
 0x16e   : > { %v2201_v61 = vsel %vm453_vm1, %v2934_v59, -inf  ;;  %v2154_v63 = vpop.f32.mrb[59].mxu1  ;;  %v1955_v1 = vmax.f32 %v1947_v36, %v1954_v60  ;;  %v1952_v7 = vsel %vm453_vm1, %v1907_v62, -inf }
 0x16f   : > { %v2202_v2 = vmax.f32 %v2194_v37, %v2201_v61  ;;  %v2199_v3 = vsel %vm453_vm1, %v2154_v63, -inf  ;;  %v1953_v4 = vmax.f32 %v1945_v42, %v1952_v7  ;;  %v2266_v63 = vstv %s2592_s13 }
 0x170   : > { %v2200_v5 = vmax.f32 %v2192_v43, %v2199_v3  ;;  %v2911_v6 = vpop.f32.mrb[60].mxu0 }
 0x171   : > { %v2937_v8 = vpop.f32.mrb[60].mxu1  ;;  %v1958_v9 = vsel %vm453_vm1, %v2911_v6, -inf  ;;  %v1917_v11 = vpop.f32.mrb[61].mxu0 }
 0x172   : > { %v2205_v10 = vsel %vm453_vm1, %v2937_v8, -inf  ;;  %v2164_v0 = vpop.f32.mrb[61].mxu1  ;;  %v1959_v12 = vmax.f32 %v1951_v51, %v1958_v9  ;;  %v1956_v14 = vsel %vm453_vm1, %v1917_v11, -inf }
 0x173   : > { %v2206_v13 = vmax.f32 %v2198_v52, %v2205_v10  ;;  %v2203_v21 = vsel %vm453_vm1, %v2164_v0, -inf  ;;  %v1957_v15 = vmax.f32 %v1949_v55, %v1956_v14 }
 0x174   : > { %v2204_v16 = vmax.f32 %v2196_v56, %v2203_v21  ;;  %v2914_v17 = vpop.f32.mrb[62].mxu0 }
 0x175   : > { %v2940_v18 = vpop.f32.mrb[62].mxu1  ;;  %v1964_v19 = vmax.f32 %v1957_v15, %v1959_v12  ;;  %v1962_v22 = vsel %vm453_vm1, %v2914_v17, -inf  ;;  %v1927_v24 = vpop.f32.mrb[63].mxu0 }
 0x176   : > { %v2211_v20 = vmax.f32 %v2204_v16, %v2206_v13  ;;  %v2209_v23 = vsel %vm453_vm1, %v2940_v18, -inf  ;;  %v2174_v25 = vpop.f32.mrb[63].mxu1  ;;  %v1963_v26 = vmax.f32 %v1955_v1, %v1962_v22  ;;  %v1960_v28 = vsel %vm453_vm1, %v1927_v24, -inf }
 0x177   : > { %v2210_v27 = vmax.f32 %v2202_v2, %v2209_v23  ;;  %v2207_v29 = vsel %vm453_vm1, %v2174_v25, -inf  ;;  %v1961_v30 = vmax.f32 %v1953_v4, %v1960_v28  ;;  %v2269_v2 = vstv %s2593_s14 }
 0x178   : > { %v2208_v31 = vmax.f32 %v2200_v5, %v2207_v29 }
 0x179   : > { %v1965_v32 = vmax.f32 %v1961_v30, %v1963_v26 }
 0x17a   : > { %v2212_v33 = vmax.f32 %v2208_v31, %v2210_v27 }
 0x17b   : > { %v1966_v34 = vmax.f32 %v1964_v19, %v1965_v32 }
 0x17c   : > { %v2213_v35 = vmax.f32 %v2211_v20, %v2212_v33 }
 0x17d   : > { %v1967_v36 = vrot.slane %v1966_v34, 4 }
 0x17e   : > { %v2214_v37 = vrot.slane %v2213_v35, 4 }
 0x17f   : > { %v1968_v38 = vmax.f32 %v1966_v34, %v1967_v36 }
 0x180   : > { %v2215_v39 = vmax.f32 %v2213_v35, %v2214_v37 }
 0x181   : > { %v1969_v40 = vrot.slane %v1968_v38, 2 }
 0x182   : > { %v2216_v41 = vrot.slane %v2215_v39, 2 }
 0x183   : > { %v1970_v42 = vmax.f32 %v1968_v38, %v1969_v40 }
 0x184   : > { %v2217_v43 = vmax.f32 %v2215_v39, %v2216_v41 }
 0x185   : > { %v1971_v44 = vrot.slane %v1970_v42, 1 }
 0x186   : > { %v2218_v45 = vrot.slane %v2217_v43, 1 }
 0x187   : > { %v1972_v46 = vmax.f32 %v1970_v42, %v1971_v44 }
 0x188   : > { %v2219_v47 = vmax.f32 %v2217_v43, %v2218_v45 }
 0x189   : > { %v2231_v49 = vsel %vm2230_vm7, %v2229_v57, %v1972_v46 }
 0x18a   : > { %v2233_v50 = vsel %vm2232_vm8, %v2231_v49, %v2219_v47 }
 0x18b   : > { %v2241_v51 = vadd.f32 %v2589_v48, %v2233_v50 }
 0x18d   : > { %vm2242_vm9 = vcmp.gt.f32.partialorder %v2241_v51, 0.0  ;;  %v2243_v52 = vmul.f32 0.2, %v2241_v51 }
 0x18f   : > { %v2244_v54 = vsel %vm2242_vm9, %v2241_v51, %v2243_v52 }
 0x190   : > { %v2252_v55 = vmul.f32 %v2590_v53, %v2244_v54 }
 0x192   : > { %v2253_v56 = vsel %vm453_vm1, %v2252_v55, 0.0 }
 0x193   : > { %2254 = vadd.xlane.f32.xlu0 %v2253_v56 }
 0x220   : > { %v2255_v59 = vpop.xlane.xlu0 %2254 }
 0x221   : > { %v2258_v60 = vadd.f32 %v2257_v58, %v2255_v59 }
 0x223   : > { %v2591_v57 = vmul.f32 -1.442695, %v2258_v60 }
 0x225   : > { %2960 = vpow2.f32 %v2591_v57 }
 0x22f   : > { %v2961_v61 = vpop.eup %2960 }
 0x230   : > { %v2262_v62 = vadd.f32 1.0, %v2961_v61 }
 0x232   : > { %2962 = vrcp.f32 %v2262_v62 }
 0x23c   : > { %v2963_v1 = vpop.eup %2962 }
 0x23d   : > { %v2267_v7 = vmul.f32 %v2963_v1, %v2266_v63 }
 0x23f   : > { %v2270_v3 = vadd.f32 %v2269_v2, %v2267_v7 }
 0x241   : > { %2272 = vst.msk [vmem:[%s241_s20] sm:$0xff] %vm2271_vm10, %v2270_v3 }
 0x242 PF: > { %s16_s18 = sadd.s32 1, %s2989_s18  }
 0x243   : > { %p13_p2 = scmp.ge.s32.totalorder %s16_s18, 4  }
 0x245   :  { %15 = sbr.rel (!%p13_p2) target bundleno = 1 (0x1), region = 82 }
 0x24c   :  { %2292 = vsyncpa [#allocation3], 1 }
 0x24d   :  { %2294 = vsyncpa [#allocation3 + $0x1], 1 }

</bundles_post_ra>
